<compile_context>
chip_gen: v7x
topology: tpu7x:2x2x1
jax: 0.10.0
libtpu: 0.0.40
codegen_flags: <defaults>
</compile_context>

<pallas_src>
import functools

import numpy as np
import jax
import jax.numpy as jnp
from jax.experimental import pallas as pl
from jax.experimental.pallas import tpu as pltpu


def _quant_linear_v2_kernel(x_ref, qw_ref, scales_ref, zeros_ref, bias_ref,
                            out_ref, w_ref, *, bits, group_size):
    """Compute one (tm, tn) output tile; dequantized weight tile cached across M."""
    pack = 32 // bits
    maxq = (1 << bits) - 1

    # Dequantize the (K, tn) weight tile once per N tile (program_id(1) is the
    # inner M axis) into a persistent bf16 VMEM scratch, reused for all M tiles.
    @pl.when(pl.program_id(1) == 0)
    def _dequantize():
        qw = jax.lax.bitcast_convert_type(qw_ref[...], jnp.uint32)      # (Kp, tn)
        Kp, tn = qw.shape
        K = Kp * pack
        G = scales_ref.shape[0]

        # Unpack along dim0: packed row r holds original rows r*pack + s.
        # Single broadcasted shift -> one (Kp, pack, tn) tensor -> one reshape.
        shift = (jax.lax.broadcasted_iota(jnp.int32, (Kp, pack, tn), 1)
                 * bits).astype(jnp.uint32)
        w_int = ((qw[:, None, :] >> shift) & jnp.uint32(maxq)).astype(jnp.float32)

        scales = scales_ref[...].astype(jnp.float32)                    # (G, tn)
        zeros = zeros_ref[...].astype(jnp.float32)                      # (G, tn)

        # V2 dequant: w_int * scale - zero  (zero is float, NOT packed).
        w = (w_int.reshape(G, group_size, tn) * scales[:, None, :]
             - zeros[:, None, :]).reshape(K, tn)
        w_ref[...] = w.astype(w_ref.dtype)                              # bf16 scratch

    x = x_ref[...].astype(jnp.bfloat16)                                 # (tm, K)
    acc = jnp.dot(x, w_ref[...], preferred_element_type=jnp.float32)    # MXU, f32 acc
    acc = acc + bias_ref[...].astype(jnp.float32)                       # (1, tn) bcast
    out_ref[...] = acc.astype(out_ref.dtype)


def quant_linear_v2(x, qweight, scales, qzeros, bias, *, bits, group_size,
                    tm=128, tn=256):
    """x: (..., K) -> (..., N). Fused dequant + matmul in one Pallas kernel."""
    orig_shape = x.shape
    K = orig_shape[-1]
    pack = 32 // bits
    Kp, N = qweight.shape
    if group_size == -1:
        group_size = K
    G = scales.shape[0]
    assert Kp * pack == K, "infeatures must be divisible by 32 // bits"
    assert G * group_size == K, "infeatures must be divisible by group_size"

    x2 = x.reshape(-1, K)
    M = x2.shape[0]

    # Output (N) tile: largest of {tn, 512, 256, 128} that divides N.
    tn = next((c for c in (tn, 512, 256, 128) if N % c == 0), N)
    # Batch (M) tile: MXU-aligned; shrink for tiny batches, pad otherwise.
    min_rows = 8 if x2.dtype == jnp.float32 else 16
    tm = min(tm, max(min_rows, -(-M // min_rows) * min_rows))
    m_pad = -(-M // tm) * tm
    if m_pad != M:
        x2 = jnp.pad(x2, ((0, m_pad - M), (0, 0)))

    if bias is None:
        bias = jnp.zeros((N,), jnp.float32)
    bias2 = bias.reshape(1, N).astype(jnp.float32)
    scales2 = scales.astype(jnp.float32)
    zeros2 = qzeros.astype(jnp.float32)

    kernel = functools.partial(_quant_linear_v2_kernel,
                               bits=bits, group_size=group_size)

    out = pl.pallas_call(
        kernel,
        out_shape=jax.ShapeDtypeStruct((m_pad, N), x.dtype),
        grid_spec=pltpu.PrefetchScalarGridSpec(
            num_scalar_prefetch=0,
            grid=(N // tn, m_pad // tm),                      # N outer, M inner
            in_specs=[
                pl.BlockSpec((tm, K), lambda n, m: (m, 0)),   # x tile
                pl.BlockSpec((Kp, tn), lambda n, m: (0, n)),  # packed qweight tile
                pl.BlockSpec((G, tn), lambda n, m: (0, n)),   # scales tile
                pl.BlockSpec((G, tn), lambda n, m: (0, n)),   # float zeros (V2)
                pl.BlockSpec((1, tn), lambda n, m: (0, n)),   # bias tile
            ],
            out_specs=pl.BlockSpec((tm, tn), lambda n, m: (m, n)),
            scratch_shapes=[pltpu.VMEM((K, tn), jnp.bfloat16)],   # dequant cache
        ),
        compiler_params=pltpu.CompilerParams(
            dimension_semantics=("parallel", "arbitrary")),
    )(x2, qweight, scales2, zeros2, bias2)

    if m_pad != M:
        out = out[:M]
    return out.reshape(*orig_shape[:-1], N)


def pack_intweight(intweight, bits):
    """Pack (K, N) uint values into (K // (32//bits), N) int32 like QuantLinearV2.pack."""
    pack = 32 // bits
    K, N = intweight.shape
    assert K % pack == 0, "infeatures must be divisible by 32 // bits"
    Kp = K // pack
    iw = intweight.astype(np.uint32).reshape(Kp, pack, N)
    qw = np.zeros((Kp, N), dtype=np.uint32)
    for j in range(pack):
        qw |= iw[:, j, :] << np.uint32(bits * j)
    return qw.view(np.int32)


if __name__ == "__main__":
    # Module config (small, but exercising the tiled kernel and M padding).
    bits = 4
    group_size = 64
    infeatures = 256      # K
    outfeatures = 512     # N  -> two tn=256 tiles (parallel grid axis)
    maxq = (1 << bits) - 1
    G = infeatures // group_size
    batch, seq = 2, 100   # M = 200 -> not a multiple of tm=128, exercises padding

    key = jax.random.PRNGKey(0)
    k_x, k_w, k_s, k_z, k_b = jax.random.split(key, 5)

    x = jax.random.normal(k_x, (batch, seq, infeatures), dtype=jnp.float32)
    intweight_np = np.asarray(
        jax.random.randint(k_w, (infeatures, outfeatures), 0, maxq + 1, dtype=jnp.int32),
        dtype=np.uint32)
    qweight = jnp.asarray(pack_intweight(intweight_np, bits))            # (K//8, N) int32
    scales = jax.random.uniform(k_s, (G, outfeatures), jnp.float32, 0.01, 0.02)
    qzeros = jax.random.uniform(k_z, (G, outfeatures), jnp.float32, -0.1, 0.1)  # float zeros (V2)
    bias = jax.random.normal(k_b, (outfeatures,), dtype=jnp.float32) * 0.1

    out = quant_linear_v2(x, qweight, scales, qzeros, bias,
                          bits=bits, group_size=group_size)
    out = jax.block_until_ready(out)

    # Reference: exact V2 dequant in f32, then weight/activation rounded to bf16
    # (mirrors torch's `weight.to(x.dtype)` cast for half-precision activations
    # and the kernel's bf16 MXU path), matmul accumulated in f32.
    def bf16(a):
        return np.asarray(jnp.asarray(a, jnp.bfloat16).astype(jnp.float32))

    scales_np = np.asarray(scales, np.float32)
    zeros_np = np.asarray(qzeros, np.float32)
    w_f32 = (intweight_np.astype(np.float32).reshape(G, group_size, outfeatures)
             * scales_np[:, None, :] - zeros_np[:, None, :]
             ).reshape(infeatures, outfeatures)
    x_np = np.asarray(x, np.float32).reshape(-1, infeatures)
    ref = bf16(x_np) @ bf16(w_f32) + np.asarray(bias, np.float32)
    ref = ref.reshape(batch, seq, outfeatures)

    np.testing.assert_allclose(np.asarray(out, np.float32), ref, rtol=5e-3, atol=5e-3)
    print("KERNEL_OK")
</pallas_src>

<mosaic_0001>
module attributes {stable_mosaic.version = 11 : i64} {
  func.func @_quant_linear_v2_kernel(%arg0: i32, %arg1: i32, %arg2: memref<128x256xf32, #tpu.memory_space<vmem>>, %arg3: memref<32x256xi32, #tpu.memory_space<vmem>>, %arg4: memref<4x256xf32, #tpu.memory_space<vmem>>, %arg5: memref<4x256xf32, #tpu.memory_space<vmem>>, %arg6: memref<1x256xf32, #tpu.memory_space<vmem>>, %arg7: memref<128x256xf32, #tpu.memory_space<vmem>>, %arg8: memref<256x256xbf16, #tpu.memory_space<vmem>>) attributes {dimension_semantics = [#tpu.dimension_semantics<parallel>, #tpu.dimension_semantics<arbitrary>], iteration_bounds = array<i64: 2, 2>, scalar_prefetch = 0 : i64, scratch_operands = 1 : i64, tpu.core_type = #tpu.core_type<tc>, window_params = [{transform_indices = @transform_0, window_bounds = array<i64: 128, 256>}, {transform_indices = @transform_1, window_bounds = array<i64: 32, 256>}, {transform_indices = @transform_2, window_bounds = array<i64: 4, 256>}, {transform_indices = @transform_3, window_bounds = array<i64: 4, 256>}, {transform_indices = @transform_4, window_bounds = array<i64: 1, 256>}, {transform_indices = @transform_5, window_bounds = array<i64: 128, 256>}]} {
    %c0_i32 = arith.constant 0 : i32
    %0 = arith.cmpi eq, %arg1, %c0_i32 : i32
    %1 = arith.extui %0 : i1 to i32
    %c0_i32_0 = arith.constant 0 : i32
    %2 = arith.cmpi ne, %1, %c0_i32_0 : i32
    scf.if %2 {
      %c0_8 = arith.constant 0 : index
      %c0_9 = arith.constant 0 : index
      %11 = vector.load %arg3[%c0_8, %c0_9] : memref<32x256xi32, #tpu.memory_space<vmem>>, vector<32x256xi32>
      %12 = tpu.bitcast %11 : vector<32x256xi32> -> vector<32x256xi32>
      %13 = tpu.iota {dimensions = array<i32: 1>} : vector<32x8x256xi32>
      %c4_i32 = arith.constant 4 : i32
      %14 = vector.broadcast %c4_i32 : i32 to vector<32x8x256xi32>
      %15 = arith.muli %13, %14 : vector<32x8x256xi32>
      %16 = vector.shape_cast %12 : vector<32x256xi32> to vector<32x1x256xi32>
      %17 = vector.broadcast %16 : vector<32x1x256xi32> to vector<32x8x256xi32>
      %18 = arith.shrui %17, %15 : vector<32x8x256xi32>
      %c15_i32 = arith.constant 15 : i32
      %19 = vector.broadcast %c15_i32 : i32 to vector<32x8x256xi32>
      %20 = arith.andi %18, %19 : vector<32x8x256xi32>
      %21 = arith.uitofp %20 : vector<32x8x256xi32> to vector<32x8x256xf32>
      %c0_10 = arith.constant 0 : index
      %c0_11 = arith.constant 0 : index
      %22 = vector.load %arg4[%c0_10, %c0_11] : memref<4x256xf32, #tpu.memory_space<vmem>>, vector<4x256xf32>
      %c0_12 = arith.constant 0 : index
      %c0_13 = arith.constant 0 : index
      %23 = vector.load %arg5[%c0_12, %c0_13] : memref<4x256xf32, #tpu.memory_space<vmem>>, vector<4x256xf32>
      %24 = vector.shape_cast %21 : vector<32x8x256xf32> to vector<4x64x256xf32>
      %25 = vector.shape_cast %22 : vector<4x256xf32> to vector<4x1x256xf32>
      %26 = vector.broadcast %25 : vector<4x1x256xf32> to vector<4x64x256xf32>
      %27 = arith.mulf %24, %26 : vector<4x64x256xf32>
      %28 = vector.shape_cast %23 : vector<4x256xf32> to vector<4x1x256xf32>
      %29 = vector.broadcast %28 : vector<4x1x256xf32> to vector<4x64x256xf32>
      %30 = arith.subf %27, %29 : vector<4x64x256xf32>
      %31 = vector.shape_cast %30 : vector<4x64x256xf32> to vector<256x256xf32>
      %32 = arith.truncf %31 : vector<256x256xf32> to vector<256x256xbf16>
      %c0_14 = arith.constant 0 : index
      %c0_15 = arith.constant 0 : index
      %33 = vector.load %arg8[%c0_14, %c0_15] : memref<256x256xbf16, #tpu.memory_space<vmem>>, vector<256x256xbf16>
      tpu.vector_store %arg8[%c0_14, %c0_15], %32 {strides = array<i32>} : memref<256x256xbf16, #tpu.memory_space<vmem>>, vector<256x256xbf16>,
    } else {
    }
    %c0 = arith.constant 0 : index
    %c0_1 = arith.constant 0 : index
    %3 = vector.load %arg2[%c0, %c0_1] : memref<128x256xf32, #tpu.memory_space<vmem>>, vector<128x256xf32>
    %4 = arith.truncf %3 : vector<128x256xf32> to vector<128x256xbf16>
    %c0_2 = arith.constant 0 : index
    %c0_3 = arith.constant 0 : index
    %5 = vector.load %arg8[%c0_2, %c0_3] : memref<256x256xbf16, #tpu.memory_space<vmem>>, vector<256x256xbf16>
    %cst = arith.constant dense<0.000000e+00> : vector<128x256xf32>
    %6 = tpu.matmul %4, %5, %cst {dimension_numbers = #tpu.dot_dimension_numbers<[1], [0], [0], [1], [0, 0, 1, 1], [], []>} : vector<128x256xbf16>, vector<256x256xbf16>, vector<128x256xf32> -> vector<128x256xf32>
    %c0_4 = arith.constant 0 : index
    %c0_5 = arith.constant 0 : index
    %7 = vector.load %arg6[%c0_4, %c0_5] : memref<1x256xf32, #tpu.memory_space<vmem>>, vector<1x256xf32>
    %8 = vector.broadcast %7 : vector<1x256xf32> to vector<128x256xf32>
    %9 = arith.addf %6, %8 : vector<128x256xf32>
    %c0_6 = arith.constant 0 : index
    %c0_7 = arith.constant 0 : index
    %10 = vector.load %arg7[%c0_6, %c0_7] : memref<128x256xf32, #tpu.memory_space<vmem>>, vector<128x256xf32>
    tpu.vector_store %arg7[%c0_6, %c0_7], %9 {strides = array<i32>} : memref<128x256xf32, #tpu.memory_space<vmem>>, vector<128x256xf32>,
    return
  }
  func.func @transform_0(%arg0: i32, %arg1: i32) -> (i32, i32) {
    %c0_i32 = arith.constant 0 : i32
    %c0_i32_0 = arith.constant 0 : i32
    return %arg1, %c0_i32 : i32, i32
  }
  func.func @transform_1(%arg0: i32, %arg1: i32) -> (i32, i32) {
    %c0_i32 = arith.constant 0 : i32
    %c0_i32_0 = arith.constant 0 : i32
    return %c0_i32, %arg0 : i32, i32
  }
  func.func @transform_2(%arg0: i32, %arg1: i32) -> (i32, i32) {
    %c0_i32 = arith.constant 0 : i32
    %c0_i32_0 = arith.constant 0 : i32
    return %c0_i32, %arg0 : i32, i32
  }
  func.func @transform_3(%arg0: i32, %arg1: i32) -> (i32, i32) {
    %c0_i32 = arith.constant 0 : i32
    %c0_i32_0 = arith.constant 0 : i32
    return %c0_i32, %arg0 : i32, i32
  }
  func.func @transform_4(%arg0: i32, %arg1: i32) -> (i32, i32) {
    %c0_i32 = arith.constant 0 : i32
    %c0_i32_0 = arith.constant 0 : i32
    return %c0_i32, %arg0 : i32, i32
  }
  func.func @transform_5(%arg0: i32, %arg1: i32) -> (i32, i32) {
    %c0_i32 = arith.constant 0 : i32
    return %arg1, %arg0 : i32, i32
  }
}

</mosaic_0001>

<bundles_post_ra>
// kernel: tpu_custom_call.1
= control target key start
LH: loop header
LB: loop body
LE: loop exit
PB: predicated region body
PF: predicated region fallthrough
CT: control target
= control target key end

     0   :  { %s3647_s0 = inlined_call_operand.hbm [shape: f32[256,256], index: 0, kind: input, shape index: {}]   ;;  %s3648_s1 = inlined_call_operand.hbm [shape: s32[32,512], index: 1, kind: input, shape index: {}]   ;;  %s3649_s2 = inlined_call_operand.hbm [shape: f32[4,512], index: 2, kind: input, shape index: {}]   ;;  %s3650_s3 = inlined_call_operand.hbm [shape: f32[4,512], index: 3, kind: input, shape index: {}]   ;;  %s3651_s4 = inlined_call_operand.vmem [shape: f32[1,512], index: 4, kind: input, shape index: {}]   ;;  %s3652_s5 = inlined_call_operand.hbm [shape: f32[256,512], index: 5, kind: output, shape index: {}]  }
   0x1   :  { %3672 = sst [smem:[#allocation30_spill]] %s3647_s0 }
   0x2   :  { %3673 = sst [smem:[#allocation31_spill]] %s3648_s1 }
   0x3   :  { %3674 = sst [smem:[#allocation32_spill]] %s3651_s4 }
   0x4   :  { %3675 = sst [smem:[#allocation33_spill]] %s3652_s5 }
   0x5   :  { %10 = vsyncpa [#allocation4], 0 }
   0x6   :  { %12 = vsyncpa [#allocation4 + $0x1], 0 }
   0x7   :  { %13 = vsyncpa [#allocation7], 0 }
   0x8   :  { %15 = vsyncpa [#allocation7 + $0x1], 0 }
   0x9   :  { %16 = vsyncpa [#allocation10], 0 }
   0xa   :  { %18 = vsyncpa [#allocation10 + $0x1], 0 }
   0xb   :  { %19 = vsyncpa [#allocation5], 0 }
   0xc   :  { %21 = vsyncpa [#allocation5 + $0x1], 0  ;;  %s2669_s18 = smov 0   ;;  %s2671_s19 = smov 0  }
   0xd   :  { %s2673_s20 = smov 0   ;;  %s2675_s21 = smov 0  }
   0xe   :  { %s2677_s22 = smov 0   ;;  %s2679_s23 = smov 0  }
   0xf   :  { %s2681_s24 = smov 0   ;;  %s2683_s25 = smov 0  }
  0x10   :  { %s2685_s26 = smov 0   ;;  %s2687_s27 = smov 0  }
  0x11   :  { %s2689_s28 = smov 0   ;;  %s2691_s29 = smov 0  }
  0x12   :  { %s2693_s30 = smov 0   ;;  %s2695_s6 = smov 0  }
  0x13 LB: > { %3676 = sst [smem:[#allocation16_spill]] %s2581_s20  ;;  %p3655_p0 = scmp.eq.s32.totalorder %s2625_s6, 0  ;;  %s2625_s6 = sphi %s2695_s6, %s27_s6   ;;  %s2621_s30 = sphi %s2693_s30, %s3741_s30   ;;  %s2617_s29 = sphi %s2691_s29, %s3734_s29   ;;  %s2613_s28 = sphi %s2689_s28, %s3740_s28   ;;  %s2609_s27 = sphi %s2687_s27, %s3733_s27   ;;  %s2605_s26 = sphi %s2685_s26, %s3732_s26   ;;  %s2601_s25 = sphi %s2683_s25, %s3731_s25   ;;  %s2597_s24 = sphi %s2681_s24, %s3730_s24   ;;  %s2593_s23 = sphi %s2679_s23, %s3729_s23   ;;  %s2589_s22 = sphi %s2677_s22, %s3739_s22   ;;  %s2585_s21 = sphi %s2675_s21, %s3738_s21   ;;  %s2581_s20 = sphi %s2673_s20, %s3727_s20   ;;  %s2577_s19 = sphi %s2671_s19, %s3737_s19   ;;  %s2573_s18 = sphi %s2669_s18, %s3736_s18  }
  0x14   : > { %3677 = sst [smem:[#allocation17_spill]] %s2593_s23  ;;  %p79_p1 = scmp.ne.s32.totalorder %s2593_s23, %s2589_s22 }
  0x15   : > { %3678 = sst [smem:[#allocation18_spill]] %s2601_s25  ;;  %p3654_p3 = scmp.lt.s32.totalorder %s2625_s6, 4 }
  0x16   : > { %3679 = sst [smem:[#allocation19_spill]] %s2605_s26  ;;  %p81_p4 = por %p79_p1, %p3655_p0 }
  0x17   : > { %3680 = sst [smem:[#allocation20_spill]] %s2609_s27  ;;  %s237_s8 = sand.u32 1, %s2625_s6  }
  0x18   : > { %3681 = sst [smem:[#allocation21_spill]] %s2613_s28  ;;  %s2750_s9 = sand.u32 1, %s2593_s23  }
  0x19   : > { %3682 = sst [smem:[#allocation22_spill]] %s2617_s29  ;;  %s2127_s10 = sshll.u32 %s2750_s9, 6 }
  0x1a   : > { %s2155_s11 = sshll.u32 %s2621_s30, 8  ;;  %s3683_s1 = sld [smem:[#allocation31_spill]] }
  0x1b   : > { %s241_s15 = scalar_lea.vmem [#allocation6], %s2127_s10  ;;  %p2761_p5 = pnand %p3654_p3, %p81_p4 }
  0x1c   : > { %s248_s16 = sshll.u32 %s241_s15, 4  ;;  %s2768_s7 = scalar_lea.sflag [#allocation7], %s237_s8  ;;  %s2765_s16 = int_to_ptr.vmem [resolvable:$true] %s248_s16 }
  0x1d   : > { %s3684_s17 = scalar_select %p2761_p5, 1, 0 }
  0x1e   : > { %p2774_p8 = pneg %p2761_p5 }
  0x20   : > { %s2757_s14 = scalar_lea.hbm %s3683_s1, %s2155_s11  ;;  %s2356_s15 = scalar_lea.hbm %s3683_s1, 2048 }
  0x21   : > { %s2351_s12 = scalar_lea.hbm %s2757_s14, 1024  ;;  %p2357_p11 = scmp.lt.u32.totalorder %s2757_s14, %s3683_s1 }
  0x22   : > { %p2352_p7 = scmp.ne.s32.totalorder %s2757_s14, %s2351_s12  ;;  %p2358_p12 = scmp.lt.u32.totalorder %s2356_s15, %s2351_s12 }
  0x23   : > { %p2360_p1 = scmp.lt.u32.totalorder %s2351_s12, %s2757_s14 }
  0x24   : > { %p2354_p9 = pnand %p2774_p8, %p2352_p7  ;;  %p2359_p13 = por %p2358_p12, %p2357_p11 }
  0x26   : > { %p2355_p10 = pneg %p2354_p9  ;;  %p2361_p4 = por %p2360_p1, %p2359_p13 }
  0x28   : > { %p2362_p3 = pnand %p2361_p4, %p2355_p10 }
  0x2a   : > { %2365 = shalt.err (!%p2362_p3)
}
  0x2b   : > { %s2366_s8 = scalar_lea.vmem %s2765_s16, 1024  ;;  %s2627_s10 = smov [#allocation6]  }
  0x2c   : > { %p2367_p7 = scmp.ne.s32.totalorder %s2765_s16, %s2366_s8  ;;  %s2371_s13 = sshll.u32 %s2627_s10, 4  ;;  %s2372_s13 = int_to_ptr.vmem [resolvable:$false] %s2371_s13 }
  0x2d   : > { %s2373_s5 = scalar_lea.vmem %s2372_s13, 2048  ;;  %p2374_p0 = scmp.lt.s32.totalorder %s2765_s16, %s2372_s13 }
  0x2e   : > { %p2369_p9 = pnand %p2367_p7, %p2774_p8  ;;  %p2375_p6 = scmp.lt.s32.totalorder %s2373_s5, %s2366_s8 }
  0x30   : > { %p2370_p2 = pneg %p2369_p9  ;;  %p2376_p11 = por %p2375_p6, %p2374_p0 }
  0x32   : > { %p2377_p12 = pnand %p2376_p11, %p2370_p2 }
  0x34   : > { %2380 = shalt.err (!%p2377_p12)
}
  0x35   : > { %s2628_s27 = smov 512   ;;  %s3656_s12 = smov 256  }
  0x36   : > { %s3657_s15 = smov 16   ;;  %p302_p0 = scmp.lt.s32.totalorder %s2625_s6, 5 }
  0x37   : > { %2207 = dma.hbm_to_vmem [thread:$0]  (!%p2761_p5), %s2757_s14, 1024, %s2765_s16, %s2768_s7, %s2628_s27, %s3656_s12, %s3657_s15  }
  0x38   : > { %p3686_p2 = scmp.ge.s32.totalorder %s2625_s6, 1  ;;  %s2808_s10 = sadd.s32 4294967295, %s2625_s6  }
  0x39   : > { %s2120_s13 = sadd.s32 4294967294, %s2625_s6   ;;  %s36_s5 = sadd.s32 1, %s2617_s29 }
  0x3a   : > { %p2803_p3 = pnand %p3686_p2, %p302_p0  ;;  %s39_s1 = sadd.s32 1, %s2621_s30 }
  0x3b   : > { %p37_p6 = scmp.ge.s32.totalorder %s36_s5, 2  ;;  %s46_s4 = sadd.s32 1, %s2605_s26 }
  0x3c   : > { %s3687_s8 = scalar_select %p2803_p3, 1, 0 }
  0x3d   : > { %p53_p10 = scmp.ne.s32.totalorder %s2605_s26, %s2601_s25  ;;  %p59_p13 = scmp.ne.s32.totalorder %s2601_s25, %s2597_s24 }
  0x3e   : > { %3688 = sst [smem:[#allocation23_spill]] %s3687_s8  ;;  %s3743_s5 = smov (%p37_p6, %s36_s5), 0 }
  0x3f   : > { %3689 = sst [smem:[#allocation24_spill]] %s3743_s5  ;;  %s3745_s1 = smov (!%p37_p6, %s39_s1), %s2621_s30 }
  0x40   : > { %s43_s14 = ssub.s32 %s2617_s29, %s3743_s5  ;;  %p3690_p1 = scmp.eq.s32.totalorder %s2625_s6, 0 }
  0x41   : > { %p41_p7 = scmp.ge.s32.totalorder %s3745_s1, 2  ;;  %p44_p9 = scmp.eq.s32.totalorder %s43_s14, 0 }
  0x42   : > { %p2825_p4 = por %p3690_p1, %p53_p10  ;;  %p60_p11 = scmp.eq.s32.totalorder %s2808_s10, 0 }
  0x43   : > { %s178_s24 = sadd.s32 1, %s2581_s20  ;;  %s3747_s1 = smov (%p41_p7, %s3745_s1), 0 }
  0x44   : > { %3692 = sst [smem:[#allocation25_spill]] %s3747_s1  ;;  %p2836_p12 = por %p60_p11, %p59_p13 }
  0x45   : > { %s2834_s27 = scalar_select %p44_p9, %s2605_s26, %s46_s4  }
  0x46   : > { %s3694_s12 = scalar_select %p2836_p12, 1, 0 }
  0x47   : > { %3693 = sst [smem:[#allocation26_spill]] %s2834_s27  ;;  %s69_s15 = ssub.s32 %s2621_s30, %s3747_s1 }
  0x48   : > { %p70_p0 = scmp.eq.s32.totalorder %s69_s15, 0  ;;  %p3695_p2 = scmp.ne.s32.totalorder %s2589_s22, %s2585_s21 }
  0x49   : > { %s175_s28 = sor.u32 %s69_s15, %s43_s14  ;;  %p188_p10 = scmp.ne.s32.totalorder %s2581_s20, %s2577_s19 }
  0x4a   : > { %p2845_p6 = por %p3695_p2, %p60_p11  ;;  %s3697_s25 = sadd.s32 1, %s2593_s23 }
  0x4b   : > { %s2854_s8 = scalar_select %p70_p0, %s2593_s23, %s3697_s25  }
  0x4c   : > { %s3696_s5 = scalar_select %p2845_p6, 1, 0 }
  0x4d   : > { %3698 = sst [smem:[#allocation27_spill]] %s2854_s8  ;;  %p176_p1 = scmp.eq.s32.totalorder %s175_s28, 0 }
  0x4e   : > { %p189_p13 = scmp.eq.s32.totalorder %s2808_s10, 3  ;;  %p194_p7 = scmp.ne.s32.totalorder %s2577_s19, %s2573_s18 }
  0x4f   : > { %p195_p9 = scmp.eq.s32.totalorder %s2120_s13, 3  ;;  %s215_s15 = sand.u32 1, %s2605_s26  }
  0x50   : > { %s2860_s4 = scalar_select %p176_p1, %s2581_s20, %s178_s24  }
  0x51   : > { %p2862_p12 = por %p189_p13, %p188_p10  ;;  %p2866_p11 = por %p195_p9, %p194_p7 }
  0x52   : > { %3699 = sst [smem:[#allocation28_spill]] %s2860_s4  ;;  %s2154_s14 = sshll.u32 %s2617_s29, 12 }
  0x53   : > { %s3700_s21 = scalar_select %p2862_p12, 1, 0 }
  0x54   : > { %s3701_s1 = scalar_select %p2866_p11, 1, 0 }
  0x55   : > { %s2123_s27 = sshll.u32 %s215_s15, 8  ;;  %s3703_s0 = sld [smem:[#allocation30_spill]] }
  0x56   : > { %3702 = sst [smem:[#allocation29_spill]] %s3701_s1  ;;  %s219_s13 = scalar_lea.vmem [#allocation3], %s2123_s27 }
  0x57   : > { %s227_s24 = sshll.u32 %s219_s13, 4  ;;  %p3704_p0 = scmp.lt.s32.totalorder %s2625_s6, 4  ;;  %s2885_s24 = int_to_ptr.vmem [resolvable:$true] %s227_s24 }
  0x58   : > { %s2130_s29 = sshll.u32 %s2750_s9, 3  ;;  %s2888_s8 = scalar_lea.sflag [#allocation4], %s215_s15 }
  0x59   : > { %p2881_p2 = pnand %p3704_p0, %p2825_p4 }
  0x5b   : > { %s2875_s28 = scalar_lea.hbm %s3703_s0, %s2154_s14  ;;  %p2383_p1 = pneg %p2881_p2 }
  0x5c   : > { %s2381_s14 = scalar_lea.hbm %s2875_s28, 4096  ;;  %s2386_s25 = scalar_lea.hbm %s3703_s0, 8192 }
  0x5d   : > { %p2382_p10 = scmp.ne.s32.totalorder %s2875_s28, %s2381_s14  ;;  %p2387_p4 = scmp.lt.u32.totalorder %s2875_s28, %s3703_s0 }
  0x5e   : > { %p2388_p9 = scmp.lt.u32.totalorder %s2386_s25, %s2381_s14  ;;  %p2390_p11 = scmp.lt.u32.totalorder %s2381_s14, %s2875_s28 }
  0x5f   : > { %p2384_p13 = pnand %p2383_p1, %p2382_p10 }
  0x60   : > { %p2389_p0 = por %p2388_p9, %p2387_p4 }
  0x61   : > { %p2385_p7 = pneg %p2384_p13 }
  0x62   : > { %p2391_p12 = por %p2390_p11, %p2389_p0 }
  0x64   : > { %p2392_p6 = pnand %p2391_p12, %p2385_p7 }
  0x66   : > { %2395 = shalt.err (!%p2392_p6)
}
  0x67   : > { %s2396_s15 = scalar_lea.vmem %s2885_s24, 4096  ;;  %s2631_s16 = smov [#allocation3]  }
  0x68   : > { %p2397_p10 = scmp.ne.s32.totalorder %s2885_s24, %s2396_s15  ;;  %s2401_s27 = sshll.u32 %s2631_s16, 4  ;;  %s2402_s27 = int_to_ptr.vmem [resolvable:$false] %s2401_s27 }
  0x69   : > { %s2403_s26 = scalar_lea.vmem %s2402_s27, 8192  ;;  %p2404_p5 = scmp.lt.s32.totalorder %s2885_s24, %s2402_s27 }
  0x6a   : > { %p2399_p13 = pnand %p2397_p10, %p2383_p1  ;;  %p2405_p4 = scmp.lt.s32.totalorder %s2403_s26, %s2396_s15 }
  0x6c   : > { %p2400_p3 = pneg %p2399_p13  ;;  %p2406_p9 = por %p2405_p4, %p2404_p5 }
  0x6e   : > { %p2407_p11 = pnand %p2406_p9, %p2400_p3 }
  0x70   : > { %2410 = shalt.err (!%p2407_p11)
}
  0x71   : > { %s3706_s14 = smov 16   ;;  %s3707_s25 = smov 256  }
  0x72   : > { %2204 = dma.hbm_to_vmem [thread:$0]  (!%p2881_p2), %s2875_s28, 4096, %s2885_s24, %s2888_s8, %s3707_s25, %s3707_s25, %s3706_s14  }
  0x73   : > { %s2156_s13 = sshll.u32 %s2621_s30, 7  ;;  %s262_s16 = scalar_lea.vmem [#allocation8], %s2130_s29 }
  0x74   : > { %s270_s15 = sshll.u32 %s262_s16, 4  ;;  %s268_s23 = scalar_lea.hbm %s3649_s2, %s2156_s13  ;;  %s271_s15 = int_to_ptr.vmem [resolvable:$true] %s270_s15 }
  0x75   : > { %s2411_s0 = scalar_lea.hbm %s268_s23, 128  ;;  %s2416_s1 = scalar_lea.hbm %s3649_s2, 256 }
  0x76   : > { %p2412_p5 = scmp.ne.s32.totalorder %s268_s23, %s2411_s0  ;;  %p2417_p6 = scmp.lt.u32.totalorder %s268_s23, %s3649_s2 }
  0x77   : > { %p2418_p2 = scmp.lt.u32.totalorder %s2416_s1, %s2411_s0  ;;  %p2420_p7 = scmp.lt.u32.totalorder %s2411_s0, %s268_s23 }
  0x78   : > { %p2414_p3 = pnand %p2412_p5, %p2774_p8 }
  0x79   : > { %p2419_p1 = por %p2418_p2, %p2417_p6 }
  0x7a   : > { %p2415_p12 = pneg %p2414_p3 }
  0x7b   : > { %p2421_p0 = por %p2420_p7, %p2419_p1 }
  0x7d   : > { %p2422_p10 = pnand %p2421_p0, %p2415_p12 }
  0x7f   : > { %2425 = shalt.err (!%p2422_p10)
}
  0x80   : > { %s2426_s8 = scalar_lea.vmem %s271_s15, 128  ;;  %s2632_s14 = smov [#allocation8]  }
  0x81   : > { %p2427_p13 = scmp.ne.s32.totalorder %s271_s15, %s2426_s8  ;;  %s2431_s25 = sshll.u32 %s2632_s14, 4  ;;  %s2432_s25 = int_to_ptr.vmem [resolvable:$false] %s2431_s25 }
  0x82   : > { %s2433_s20 = scalar_lea.vmem %s2432_s25, 256  ;;  %p2434_p11 = scmp.lt.s32.totalorder %s271_s15, %s2432_s25 }
  0x83   : > { %p2429_p4 = pnand %p2427_p13, %p2774_p8  ;;  %p2435_p5 = scmp.lt.s32.totalorder %s2433_s20, %s2426_s8 }
  0x85   : > { %p2430_p9 = pneg %p2429_p4  ;;  %p2436_p3 = por %p2435_p5, %p2434_p11 }
  0x87   : > { %p2437_p2 = pnand %p2436_p3, %p2430_p9 }
  0x89   : > { %2440 = shalt.err (!%p2437_p2)
}
  0x8a   : > { %p3708_p6 = scmp.ne.s32.totalorder %s3684_s17, 0  ;;  %s2945_s4 = scalar_lea.hbm %s3650_s3, %s2156_s13 }
  0x8b   : > { %s281_s16 = scalar_lea.vmem [#allocation9], %s2130_s29  ;;  %s278_s26 = scalar_lea.sflag [#allocation10], %s2750_s9 }
  0x8c   : > { %2210 = dma.hbm_to_vmem [thread:$0]  (!%p3708_p6), %s268_s23, 128, %s271_s15, %s2768_s7  }
  0x8d   : > { %s289_s27 = sshll.u32 %s281_s16, 4  ;;  %s2441_s28 = scalar_lea.hbm %s2945_s4, 128  ;;  %s290_s27 = int_to_ptr.vmem [resolvable:$true] %s289_s27 }
  0x8e   : > { %p2442_p12 = scmp.ne.s32.totalorder %s2945_s4, %s2441_s28  ;;  %s2446_s23 = scalar_lea.hbm %s3650_s3, 256 }
  0x8f   : > { %p2447_p0 = scmp.lt.u32.totalorder %s2945_s4, %s3650_s3  ;;  %p2448_p10 = scmp.lt.u32.totalorder %s2446_s23, %s2441_s28 }
  0x90   : > { %p2444_p1 = pnand %p2442_p12, %p2774_p8  ;;  %p2450_p4 = scmp.lt.u32.totalorder %s2441_s28, %s2945_s4 }
  0x91   : > { %p2449_p13 = por %p2448_p10, %p2447_p0 }
  0x92   : > { %p2445_p7 = pneg %p2444_p1 }
  0x93   : > { %p2451_p9 = por %p2450_p4, %p2449_p13 }
  0x95   : > { %p2452_p11 = pnand %p2451_p9, %p2445_p7 }
  0x97   : > { %2455 = shalt.err (!%p2452_p11)
}
  0x98   : > { %s2456_s29 = scalar_lea.vmem %s290_s27, 128  ;;  %s2633_s9 = smov [#allocation9]  }
  0x99   : > { %p2457_p5 = scmp.ne.s32.totalorder %s290_s27, %s2456_s29  ;;  %s2461_s8 = sshll.u32 %s2633_s9, 4  ;;  %s2462_s8 = int_to_ptr.vmem [resolvable:$false] %s2461_s8 }
  0x9a   : > { %s2463_s14 = scalar_lea.vmem %s2462_s8, 256  ;;  %p2464_p12 = scmp.lt.s32.totalorder %s290_s27, %s2462_s8 }
  0x9b   : > { %p2459_p3 = pnand %p2457_p5, %p2774_p8  ;;  %p2465_p1 = scmp.lt.s32.totalorder %s2463_s14, %s2456_s29 }
  0x9d   : > { %p2460_p2 = pneg %p2459_p3  ;;  %p2466_p6 = por %p2465_p1, %p2464_p12 }
  0x9f   : > { %p2467_p0 = pnand %p2466_p6, %p2460_p2 }
  0xa1   : > { %2470 = shalt.err (!%p2467_p0)
}
  0xa2   : > { %p3709_p10 = scmp.ne.s32.totalorder %s3684_s17, 0  ;;  %s3710_s25 = sld [smem:[#allocation23_spill]] }
  0xa4   : > { %2213 = dma.hbm_to_vmem [thread:$0]  (!%p3709_p10), %s2945_s4, 128, %s290_s27, %s278_s26  }
  0xa8   : > { %p3711_p7 = scmp.ne.s32.totalorder %s3710_s25, 0 }
  0xa9   : > { %s3712_s20 = sld [smem:[#allocation18_spill]] (!%p3711_p7)  ;;  %p3713_p8 = scmp.ne.s32.totalorder (!%p3711_p7), %s3694_s12, 0 }
  0xaa   : > { %306 = sbr.rel (%p3711_p7) target bundleno = 736 (0x2e0), region = 40 }
  0xaf   : > { %s308_s11 = sand.u32 (!%p3711_p7), 1, %s3712_s20  }
  0xb0   : > { %s2137_s0 = sshll.u32 (!%p3711_p7), %s308_s11, 8  ;;  %s309_s1 = scalar_lea.sflag (!%p3711_p7), [#allocation4], %s308_s11 }
  0xb1   : > { %s2970_s16 = scalar_lea.vmem [#allocation3], %s2137_s0 }
  0xb2   : > { %2556 = dma.done.wait (%p3713_p8), %s309_s1, 4096  }
  0xb3   : > { %2558 = vsyncadd (%p3713_p8), %s309_s1, 4294963200  ;;  %s317_s17 = sand.u32 1, %s2808_s10   ;;  %s319_s4 = sand.u32 1, %s2589_s22  }
  0xb4   : > { %s2138_s27 = sshll.u32 %s319_s4, 6  ;;  %s318_s26 = scalar_lea.sflag [#allocation7], %s317_s17 }
  0xb5   : > { %s2978_s28 = scalar_lea.vmem [#allocation6], %s2138_s27  ;;  %p3714_p6 = scmp.ne.s32.totalorder %s3696_s5, 0 }
  0xb7   : > { %2560 = dma.done.wait (%p3714_p6), %s318_s26, 1152  }
  0xb8   : > { %2562 = vsyncadd (%p3714_p6), %s318_s26, 4294966144  ;;  %s2139_s7 = sshll.u32 %s319_s4, 3  ;;  %s336_s23 = scalar_lea.sflag [#allocation10], %s319_s4 }
  0xb9   : > { %s330_s15 = scalar_lea.vmem [#allocation8], %s2139_s7  ;;  %s339_s12 = scalar_lea.vmem [#allocation9], %s2139_s7 }
  0xba   : > { %2564 = dma.done.wait (%p3714_p6), %s336_s23, 128  }
  0xbb   : > { %2566 = vsyncadd (%p3714_p6), %s336_s23, 4294967168  ;;  %s3715_s10 = sld [smem:[#allocation21_spill]]  ;;  %s382_s13 = sand.u32 1, %s2577_s19  }
  0xbc   : > { %s2141_s29 = sshll.u32 %s382_s13, 8  ;;  %s3716_s25 = sld [smem:[#allocation32_spill]] }
  0xbd   : > { %s3002_s5 = scalar_lea.vmem [#allocation11], %s2141_s29  ;;  %s3717_s11 = sld [smem:[#allocation20_spill]] }
  0xc1   : > { %s2990_s24 = sshll.u32 %s3715_s10, 1 }
  0xc2   : > { %p390_p13 = scmp.lt.s32.totalorder %s2990_s24, 3 }
  0xc3   : > { %p2143_p4 = scmp.ne.s32.totalorder %s3717_s11, 0 }
  0xc4   : > { %s2996_s9 = scalar_select %p390_p13, %s2990_s24, 3 }
  0xc5   : > { %399 = sbr.rel (%p2143_p4) target bundleno = 414 (0x19e), region = 60  ;;  %v408_v0 = vlaneseq (!%p2143_p4)  ;;  %v2634_v1 = vmov (!%p2143_p4), 1966171168   ;;  %v2144_v3 = vld.sshfl [vmem:[%s330_s15] sm:$0xff pattern:$0x75316420] (!%p2143_p4) }
  0xc6   : > { %s392_s20 = scalar_lea.vmem %s3716_s25, %s2996_s9  ;;  %v414_v2 = vunpack.c.l.s4 (!%p2143_p4), %v2634_v1  ;;  %v2145_v4 = vld.sshfl [vmem:[%s339_s12] sm:$0xff pattern:$0x75316420] (!%p2143_p4)  ;;  %v2339_v6 = vld [vmem:[%s2978_s28] ss:$8 sps:$4 sm:$0xff] (!%p2143_p4)   ;;  %v1389_v10 = vcombine.high (!%p2143_p4), %v2144_v3, %v2144_v3 }
  0xc7   : > { %v409_v5 = vshrl.u32 (!%p2143_p4), %v408_v0, 7  ;;  %v2341_v8 = vld [vmem:[%s2978_s28 + $0x4] ss:$8 sps:$4 sm:$0xff] (!%p2143_p4)   ;;  %v2342_v9 = vld [vmem:[%s2978_s28 + $0x10] ss:$8 sps:$4 sm:$0xff] (!%p2143_p4)   ;;  %v1518_v11 = vcombine.high (!%p2143_p4), %v2145_v4, %v2145_v4 }
  0xc8   : > { %v415_v7 = vunpack.c.0.s8 (!%p2143_p4), %v414_v2  ;;  %v2344_v12 = vld [vmem:[%s2978_s28 + $0x14] ss:$8 sps:$4 sm:$0xff] (!%p2143_p4)  }
  0xc9   : > { %v3011_v14 = vmul.u32 (!%p2143_p4), 4, %v409_v5  ;;  %v3013_v15 = vsub.s32 (!%p2143_p4), 0, %v409_v5  ;;  %v3015_v16 = vsub.s32 (!%p2143_p4), 1, %v409_v5 }
  0xca   : > { %v3009_v13 = vsub.s32 (!%p2143_p4), %v415_v7, %v409_v5 }
  0xcc   : > { %v419_v17 = vrot.slane %v2339_v6, %v3009_v13  ;;  %v3019_v18 = vrot.slane %v2144_v3, %v3009_v13  ;;  %v3022_v19 = vrot.slane %v2145_v4, %v3009_v13  ;;  %v426_v20 = vrot.slane %v2341_v8, %v3009_v13 }
  0xcd   : > { %v3026_v21 = vrot.slane %v2342_v9, %v3009_v13  ;;  %v3029_v22 = vrot.slane %v1389_v10, %v3009_v13  ;;  %v3032_v23 = vrot.slane %v1518_v11, %v3009_v13  ;;  %v3035_v24 = vrot.slane %v2344_v12, %v3009_v13 }
  0xce   : > { %v427_v25 = vcombine.high %v419_v17, %v419_v17  ;;  %v435_v26 = vrot.slane %v419_v17, %v3009_v13  ;;  %v3040_v27 = vrot.slane %v3019_v18, %v3013_v15  ;;  %v3044_v28 = vrot.slane %v3022_v19, %v3013_v15 }
  0xcf   : > { %v3048_v29 = vrot.slane %v3019_v18, %v3015_v16  ;;  %v3052_v30 = vrot.slane %v3022_v19, %v3015_v16  ;;  %v428_v31 = vcombine.high %v426_v20, %v426_v20  ;;  %v3055_v32 = vrot.slane %v426_v20, %v3009_v13 }
  0xd0   : > { %v449_v33 = vrot.slane %v427_v25, %v3009_v13  ;;  %v614_v34 = vrot.slane %v435_v26, %v3013_v15  ;;  %v618_v35 = vrot.slane %v435_v26, %v3015_v16  ;;  %v457_v36 = vcombine.high %v435_v26, %v435_v26 }
  0xd1   : > { %v3061_v37 = vrot.slane %v428_v31, %v3009_v13  ;;  %v646_v38 = vrot.slane %v3055_v32, %v3013_v15  ;;  %v650_v39 = vrot.slane %v3055_v32, %v3015_v16  ;;  %v3069_v40 = vcombine.high %v3055_v32, %v3055_v32 }
  0xd2   : > { %v622_v41 = vrot.slane %v449_v33, %v3013_v15  ;;  %v867_v42 = vshrl.u32 %v614_v34, %v3011_v14  ;;  %v626_v43 = vrot.slane %v449_v33, %v3015_v16  ;;  %v868_v44 = vshrl.u32 %v618_v35, %v3011_v14 }
  0xd3   : > { %v459_v45 = vcombine.high %v449_v33, %v449_v33  ;;  %v630_v46 = vrot.slane %v457_v36, %v3013_v15  ;;  %v634_v47 = vrot.slane %v457_v36, %v3015_v16  ;;  %v654_v48 = vrot.slane %v3061_v37, %v3013_v15 }
  0xd4   : > { %v869_v49 = vshrl.u32 %v622_v41, %v3011_v14  ;;  %v931_v50 = vand.u32 15, %v867_v42  ;;  %v870_v51 = vshrl.u32 %v626_v43, %v3011_v14  ;;  %v932_v52 = vand.u32 15, %v868_v44 }
  0xd5   : > { %v638_v53 = vrot.slane %v459_v45, %v3013_v15  ;;  %v871_v54 = vshrl.u32 %v630_v46, %v3011_v14  ;;  %v642_v55 = vrot.slane %v459_v45, %v3015_v16  ;;  %v872_v56 = vshrl.u32 %v634_v47, %v3011_v14 }
  0xd6   : > { %v933_v57 = vand.u32 15, %v869_v49  ;;  %v995_v58 = vshrl.u32 %v931_v50, 16  ;;  %v996_v59 = vand.u32 65535, %v931_v50  ;;  %v934_v60 = vand.u32 15, %v870_v51 }
  0xd7   : > { %v1001_v61 = vshrl.u32 %v932_v52, 16  ;;  %v1002_v62 = vand.u32 65535, %v932_v52  ;;  %v873_v63 = vshrl.u32 %v638_v53, %v3011_v14  ;;  %v935_v0 = vand.u32 15, %v871_v54 }
  0xd8   : > { %v997_v1 = vcvt.s32.f32 %v995_v58  ;;  %v999_v2 = vcvt.s32.f32 %v996_v59  ;;  %v1007_v3 = vshrl.u32 %v933_v57, 16  ;;  %v1008_v4 = vand.u32 65535, %v933_v57 }
  0xd9   : > { %v1003_v5 = vcvt.s32.f32 %v1001_v61  ;;  %v1005_v6 = vcvt.s32.f32 %v1002_v62  ;;  %v1013_v7 = vshrl.u32 %v934_v60, 16  ;;  %v1014_v8 = vand.u32 65535, %v934_v60 }
  0xda   : > { %v998_v9 = vmul.f32 65536.0, %v997_v1  ;;  %v1009_v10 = vcvt.s32.f32 %v1007_v3  ;;  %v1011_v11 = vcvt.s32.f32 %v1008_v4  ;;  %v937_v12 = vand.u32 15, %v873_v63 }
  0xdb   : > { %v1004_v17 = vmul.f32 65536.0, %v1003_v5  ;;  %v1015_v20 = vcvt.s32.f32 %v1013_v7  ;;  %v1017_v25 = vcvt.s32.f32 %v1014_v8  ;;  %v1019_v26 = vshrl.u32 %v935_v0, 16 }
  0xdc   : > { %v1000_v31 = vadd.f32 %v999_v2, %v998_v9  ;;  %v1010_v33 = vmul.f32 65536.0, %v1009_v10  ;;  %v1020_v34 = vand.u32 65535, %v935_v0  ;;  %v1031_v35 = vshrl.u32 %v937_v12, 16 }
  0xdd   : > { %v1006_v36 = vadd.f32 %v1005_v6, %v1004_v17  ;;  %v1016_v41 = vmul.f32 65536.0, %v1015_v20  ;;  %v1021_v42 = vcvt.s32.f32 %v1019_v26  ;;  %v1032_v43 = vand.u32 65535, %v937_v12 }
  0xde   : > { %v1012_v44 = vadd.f32 %v1011_v11, %v1010_v33  ;;  %v1446_v45 = vmul.f32 %v3040_v27, %v1000_v31  ;;  %v1023_v46 = vcvt.s32.f32 %v1020_v34  ;;  %v1033_v47 = vcvt.s32.f32 %v1031_v35 }
  0xdf   : > { %v1018_v49 = vadd.f32 %v1017_v25, %v1016_v41  ;;  %v1447_v50 = vmul.f32 %v3048_v29, %v1006_v36  ;;  %v1022_v51 = vmul.f32 65536.0, %v1021_v42  ;;  %v1035_v52 = vcvt.s32.f32 %v1032_v43 }
  0xe0   : > { %v1448_v53 = vmul.f32 %v3040_v27, %v1012_v44  ;;  %v1575_v54 = vsub.f32 %v1446_v45, %v3044_v28  ;;  %v1034_v57 = vmul.f32 65536.0, %v1033_v47  ;;  %v874_v58 = vshrl.u32 %v642_v55, %v3011_v14 }
  0xe1   : > { %v1449_v59 = vmul.f32 %v3048_v29, %v1018_v49  ;;  %v1576_v60 = vsub.f32 %v1447_v50, %v3052_v30  ;;  %v1024_v61 = vadd.f32 %v1023_v46, %v1022_v51  ;;  %v936_v62 = vand.u32 15, %v872_v56 }
  0xe2   : > { %v1577_v63 = vsub.f32 %v1448_v53, %v3044_v28  ;;  %v1036_v0 = vadd.f32 %v1035_v52, %v1034_v57  ;;  %v938_v1 = vand.u32 15, %v874_v58  ;;  %v875_v2 = vshrl.u32 %v646_v38, %v3011_v14 }
  0xe3   : > { %v1578_v3 = vsub.f32 %v1449_v59, %v3052_v30  ;;  %v1450_v4 = vmul.f32 %v3040_v27, %v1024_v61  ;;  %v1025_v55 = vshrl.u32 %v936_v62, 16  ;;  %v1026_v5 = vand.u32 65535, %v936_v62 }
  0xe4   : > { %v1639_v6 = vpack.c.bf16 %v1577_v63, %v1575_v54  ;;  %v1452_v7 = vmul.f32 %v3040_v27, %v1036_v0  ;;  %v1037_v8 = vshrl.u32 %v938_v1, 16  ;;  %v1038_v56 = vand.u32 65535, %v938_v1 }
  0xe5   : > { %v1640_v9 = vpack.c.bf16 %v1578_v3, %v1576_v60  ;;  %v1579_v10 = vsub.f32 %v1450_v4, %v3044_v28  ;;  %v1027_v11 = vcvt.s32.f32 %v1025_v55  ;;  %v1029_v12 = vcvt.s32.f32 %v1026_v5 }
  0xe6   : > { %1671 = vst [vmem:[#allocation2] sm:$0xff] %v1639_v6  ;;  %v1581_v17 = vsub.f32 %v1452_v7, %v3044_v28  ;;  %v1039_v38 = vcvt.s32.f32 %v1037_v8  ;;  %v1041_v20 = vcvt.s32.f32 %v1038_v56  ;;  %v877_v25 = vshrl.u32 %v654_v48, %v3011_v14 }
  0xe7   : > { %1672 = vst [vmem:[#allocation2 + $0x8] sm:$0xff] %v1640_v9  ;;  %v1028_v26 = vmul.f32 65536.0, %v1027_v11  ;;  %v939_v31 = vand.u32 15, %v875_v2  ;;  %v658_v33 = vrot.slane %v3061_v37, %v3015_v16  ;;  %v876_v34 = vshrl.u32 %v650_v39, %v3011_v14 }
  0xe8   : > { %v1641_v35 = vpack.c.bf16 %v1581_v17, %v1579_v10  ;;  %v1040_v36 = vmul.f32 65536.0, %v1039_v38  ;;  %v941_v41 = vand.u32 15, %v877_v25  ;;  %v460_v42 = vcombine.high %v3061_v37, %v3061_v37 }
  0xe9   : > { %v1030_v43 = vadd.f32 %v1029_v12, %v1028_v26  ;;  %v1043_v44 = vshrl.u32 %v939_v31, 16  ;;  %v1044_v48 = vand.u32 65535, %v939_v31  ;;  %v878_v45 = vshrl.u32 %v658_v33, %v3011_v14 }
  0xea   : > { %1673 = vst [vmem:[#allocation2 + $0x10] sm:$0xff] %v1641_v35  ;;  %v1042_v46 = vadd.f32 %v1041_v20, %v1040_v36  ;;  %v1055_v47 = vshrl.u32 %v941_v41, 16  ;;  %v1056_v49 = vand.u32 65535, %v941_v41  ;;  %v940_v50 = vand.u32 15, %v876_v34 }
  0xeb   : > { %v1451_v51 = vmul.f32 %v3048_v29, %v1030_v43  ;;  %v1045_v32 = vcvt.s32.f32 %v1043_v44  ;;  %v1047_v39 = vcvt.s32.f32 %v1044_v48  ;;  %v942_v52 = vand.u32 15, %v878_v45 }
  0xec   : > { %v1453_v53 = vmul.f32 %v3048_v29, %v1042_v46  ;;  %v1057_v54 = vcvt.s32.f32 %v1055_v47  ;;  %v1059_v57 = vcvt.s32.f32 %v1056_v49  ;;  %v1049_v37 = vshrl.u32 %v940_v50, 16 }
  0xed   : > { %v1580_v58 = vsub.f32 %v1451_v51, %v3052_v30  ;;  %v1046_v59 = vmul.f32 65536.0, %v1045_v32  ;;  %v1050_v60 = vand.u32 65535, %v940_v50  ;;  %v1061_v61 = vshrl.u32 %v942_v52, 16 }
  0xee   : > { %v1582_v62 = vsub.f32 %v1453_v53, %v3052_v30  ;;  %v1058_v63 = vmul.f32 65536.0, %v1057_v54  ;;  %v1051_v0 = vcvt.s32.f32 %v1049_v37  ;;  %v1062_v1 = vand.u32 65535, %v942_v52 }
  0xef   : > { %v1048_v2 = vadd.f32 %v1047_v39, %v1046_v59  ;;  %v1053_v3 = vcvt.s32.f32 %v1050_v60  ;;  %v1063_v4 = vcvt.s32.f32 %v1061_v61  ;;  %v662_v55 = vrot.slane %v3069_v40, %v3013_v15 }
  0xf0   : > { %v1642_v5 = vpack.c.bf16 %v1582_v62, %v1580_v58  ;;  %v1060_v6 = vadd.f32 %v1059_v57, %v1058_v63  ;;  %v1052_v7 = vmul.f32 65536.0, %v1051_v0  ;;  %v1065_v8 = vcvt.s32.f32 %v1062_v1 }
  0xf1   : > { %v1454_v56 = vmul.f32 %v3040_v27, %v1048_v2  ;;  %v1064_v9 = vmul.f32 65536.0, %v1063_v4  ;;  %v670_v10 = vrot.slane %v460_v42, %v3013_v15  ;;  %v879_v11 = vshrl.u32 %v662_v55, %v3011_v14 }
  0xf2   : > { %1674 = vst [vmem:[#allocation2 + $0x18] sm:$0xff] %v1642_v5  ;;  %v1456_v12 = vmul.f32 %v3040_v27, %v1060_v6  ;;  %v1054_v17 = vadd.f32 %v1053_v3, %v1052_v7  ;;  %v666_v38 = vrot.slane %v3069_v40, %v3015_v16  ;;  %v674_v20 = vrot.slane %v460_v42, %v3015_v16 }
  0xf3   : > { %v1583_v25 = vsub.f32 %v1454_v56, %v3044_v28  ;;  %v1066_v26 = vadd.f32 %v1065_v8, %v1064_v9  ;;  %v881_v31 = vshrl.u32 %v670_v10, %v3011_v14  ;;  %v943_v33 = vand.u32 15, %v879_v11 }
  0xf4   : > { %v1585_v34 = vsub.f32 %v1456_v12, %v3044_v28  ;;  %v1455_v35 = vmul.f32 %v3048_v29, %v1054_v17  ;;  %v880_v36 = vshrl.u32 %v666_v38, %v3011_v14  ;;  %v882_v41 = vshrl.u32 %v674_v20, %v3011_v14 }
  0xf5   : > { %v1457_v43 = vmul.f32 %v3048_v29, %v1066_v26  ;;  %v945_v44 = vand.u32 15, %v881_v31  ;;  %v1067_v40 = vshrl.u32 %v943_v33, 16  ;;  %v1068_v48 = vand.u32 65535, %v943_v33 }
  0xf6   : > { %v1643_v42 = vpack.c.bf16 %v1585_v34, %v1583_v25  ;;  %v1584_v45 = vsub.f32 %v1455_v35, %v3052_v30  ;;  %v944_v46 = vand.u32 15, %v880_v36  ;;  %v946_v47 = vand.u32 15, %v882_v41 }
  0xf7   : > { %v1586_v49 = vsub.f32 %v1457_v43, %v3052_v30  ;;  %v1069_v50 = vcvt.s32.f32 %v1067_v40  ;;  %v1071_v51 = vcvt.s32.f32 %v1068_v48  ;;  %v1079_v32 = vshrl.u32 %v945_v44, 16 }
  0xf8   : > { %1675 = vst [vmem:[#allocation2 + $0x20] sm:$0xff] %v1643_v42  ;;  %v1080_v39 = vand.u32 65535, %v945_v44  ;;  %v1073_v52 = vshrl.u32 %v944_v46, 16  ;;  %v1074_v53 = vand.u32 65535, %v944_v46  ;;  %v1085_v54 = vshrl.u32 %v946_v47, 16 }
  0xf9   : > { %v1644_v57 = vpack.c.bf16 %v1586_v49, %v1584_v45  ;;  %v1070_v37 = vmul.f32 65536.0, %v1069_v50  ;;  %v1081_v58 = vcvt.s32.f32 %v1079_v32  ;;  %v1086_v59 = vand.u32 65535, %v946_v47 }
  0xfa   : > { %v1083_v60 = vcvt.s32.f32 %v1080_v39  ;;  %v1075_v61 = vcvt.s32.f32 %v1073_v52  ;;  %v1077_v62 = vcvt.s32.f32 %v1074_v53  ;;  %v1087_v63 = vcvt.s32.f32 %v1085_v54 }
  0xfb   : > { %1676 = vst [vmem:[#allocation2 + $0x28] sm:$0xff] %v1644_v57  ;;  %v1072_v0 = vadd.f32 %v1071_v51, %v1070_v37  ;;  %v1082_v1 = vmul.f32 65536.0, %v1081_v58  ;;  %v1089_v2 = vcvt.s32.f32 %v1086_v59  ;;  %v477_v3 = vcombine.high %v3026_v21, %v3026_v21 }
  0xfc   : > { %v1076_v4 = vmul.f32 65536.0, %v1075_v61  ;;  %v1088_v55 = vmul.f32 65536.0, %v1087_v63  ;;  %v485_v5 = vrot.slane %v3026_v21, %v3009_v13  ;;  %v3144_v6 = vrot.slane %v3029_v22, %v3013_v15 }
  0xfd   : > { %v1084_v7 = vadd.f32 %v1083_v60, %v1082_v1  ;;  %v1458_v8 = vmul.f32 %v3040_v27, %v1072_v0  ;;  %v499_v56 = vrot.slane %v477_v3, %v3009_v13  ;;  %v3150_v9 = vrot.slane %v3032_v23, %v3013_v15 }
  0xfe   : > { %v1078_v10 = vadd.f32 %v1077_v62, %v1076_v4  ;;  %v1090_v11 = vadd.f32 %v1089_v2, %v1088_v55  ;;  %v678_v12 = vrot.slane %v485_v5, %v3013_v15  ;;  %v682_v17 = vrot.slane %v485_v5, %v3015_v16 }
  0xff   : > { %v1460_v21 = vmul.f32 %v3040_v27, %v1084_v7  ;;  %v1587_v38 = vsub.f32 %v1458_v8, %v3044_v28  ;;  %v686_v20 = vrot.slane %v499_v56, %v3013_v15  ;;  %v690_v25 = vrot.slane %v499_v56, %v3015_v16 }
 0x100   : > { %v1459_v26 = vmul.f32 %v3048_v29, %v1078_v10  ;;  %v1461_v31 = vmul.f32 %v3048_v29, %v1090_v11  ;;  %v883_v33 = vshrl.u32 %v678_v12, %v3011_v14  ;;  %v884_v34 = vshrl.u32 %v682_v17, %v3011_v14 }
 0x101   : > { %v1589_v35 = vsub.f32 %v1460_v21, %v3044_v28  ;;  %v885_v36 = vshrl.u32 %v686_v20, %v3011_v14  ;;  %v886_v27 = vshrl.u32 %v690_v25, %v3011_v14  ;;  %v3167_v41 = vrot.slane %v3029_v22, %v3015_v16 }
 0x102   : > { %v1588_v43 = vsub.f32 %v1459_v26, %v3052_v30  ;;  %v1590_v44 = vsub.f32 %v1461_v31, %v3052_v30  ;;  %v947_v40 = vand.u32 15, %v883_v33  ;;  %v948_v29 = vand.u32 15, %v884_v34 }
 0x103   : > { %v1645_v48 = vpack.c.bf16 %v1589_v35, %v1587_v38  ;;  %v949_v42 = vand.u32 15, %v885_v36  ;;  %v950_v45 = vand.u32 15, %v886_v27  ;;  %v3173_v28 = vrot.slane %v3032_v23, %v3015_v16 }
 0x104   : > { %v1646_v46 = vpack.c.bf16 %v1590_v44, %v1588_v43  ;;  %v1091_v47 = vshrl.u32 %v947_v40, 16  ;;  %v1092_v49 = vand.u32 65535, %v947_v40  ;;  %v1097_v50 = vshrl.u32 %v948_v29, 16 }
 0x105   : > { %1677 = vst [vmem:[#allocation2 + $0x30] sm:$0xff] %v1645_v48  ;;  %v1103_v51 = vshrl.u32 %v949_v42, 16  ;;  %v1104_v32 = vand.u32 65535, %v949_v42  ;;  %v1098_v39 = vand.u32 65535, %v948_v29  ;;  %v1109_v52 = vshrl.u32 %v950_v45, 16 }
 0x106   : > { %1678 = vst [vmem:[#allocation2 + $0x38] sm:$0xff] %v1646_v46  ;;  %v1093_v30 = vcvt.s32.f32 %v1091_v47  ;;  %v1095_v53 = vcvt.s32.f32 %v1092_v49  ;;  %v1099_v54 = vcvt.s32.f32 %v1097_v50  ;;  %v1110_v57 = vand.u32 65535, %v950_v45 }
 0x107   : > { %v1105_v37 = vcvt.s32.f32 %v1103_v51  ;;  %v1107_v58 = vcvt.s32.f32 %v1104_v32  ;;  %v1101_v59 = vcvt.s32.f32 %v1098_v39  ;;  %v1111_v60 = vcvt.s32.f32 %v1109_v52  ;;  %v2345_v32 = vld [vmem:[%s2978_s28 + $0x20] ss:$8 sps:$4 sm:$0xff]  }
 0x108   : > { %v1094_v61 = vmul.f32 65536.0, %v1093_v30  ;;  %v1100_v62 = vmul.f32 65536.0, %v1099_v54  ;;  %v1113_v63 = vcvt.s32.f32 %v1110_v57  ;;  %v507_v0 = vcombine.high %v485_v5, %v485_v5 }
 0x109   : > { %v1106_v1 = vmul.f32 65536.0, %v1105_v37  ;;  %v1112_v2 = vmul.f32 65536.0, %v1111_v60  ;;  %v509_v3 = vcombine.high %v499_v56, %v499_v56  ;;  %v478_v4 = vcombine.high %v3035_v24, %v3035_v24 }
 0x10a   : > { %v1096_v55 = vadd.f32 %v1095_v53, %v1094_v61  ;;  %v1102_v7 = vadd.f32 %v1101_v59, %v1100_v62  ;;  %v694_v8 = vrot.slane %v507_v0, %v3013_v15  ;;  %v698_v10 = vrot.slane %v507_v0, %v3015_v16 }
 0x10b   : > { %v1108_v11 = vadd.f32 %v1107_v58, %v1106_v1  ;;  %v1114_v12 = vadd.f32 %v1113_v63, %v1112_v2  ;;  %v702_v17 = vrot.slane %v509_v3, %v3013_v15  ;;  %v706_v21 = vrot.slane %v509_v3, %v3015_v16 }
 0x10c   : > { %v1462_v5 = vmul.f32 %v3144_v6, %v1096_v55  ;;  %v1463_v38 = vmul.f32 %v3167_v41, %v1102_v7  ;;  %v887_v56 = vshrl.u32 %v694_v8, %v3011_v14  ;;  %v888_v20 = vshrl.u32 %v698_v10, %v3011_v14 }
 0x10d   : > { %v1464_v25 = vmul.f32 %v3144_v6, %v1108_v11  ;;  %v1465_v26 = vmul.f32 %v3167_v41, %v1114_v12  ;;  %v889_v31 = vshrl.u32 %v702_v17, %v3011_v14  ;;  %v890_v33 = vshrl.u32 %v706_v21, %v3011_v14 }
 0x10e   : > { %v1591_v34 = vsub.f32 %v1462_v5, %v3150_v9  ;;  %v1592_v35 = vsub.f32 %v1463_v38, %v3173_v28  ;;  %v951_v36 = vand.u32 15, %v887_v56  ;;  %v952_v27 = vand.u32 15, %v888_v20 }
 0x10f   : > { %v1593_v43 = vsub.f32 %v1464_v25, %v3150_v9  ;;  %v1594_v44 = vsub.f32 %v1465_v26, %v3173_v28  ;;  %v953_v40 = vand.u32 15, %v889_v31  ;;  %v954_v29 = vand.u32 15, %v890_v33 }
 0x110   : > { %v1115_v48 = vshrl.u32 %v951_v36, 16  ;;  %v1116_v42 = vand.u32 65535, %v951_v36  ;;  %v1121_v45 = vshrl.u32 %v952_v27, 16  ;;  %v1122_v46 = vand.u32 65535, %v952_v27 }
 0x111   : > { %v1647_v47 = vpack.c.bf16 %v1593_v43, %v1591_v34  ;;  %v1648_v49 = vpack.c.bf16 %v1594_v44, %v1592_v35  ;;  %v1127_v50 = vshrl.u32 %v953_v40, 16  ;;  %v1128_v51 = vand.u32 65535, %v953_v40 }
 0x112   : > { %v1117_v39 = vcvt.s32.f32 %v1115_v48  ;;  %v1119_v52 = vcvt.s32.f32 %v1116_v42  ;;  %v1123_v30 = vcvt.s32.f32 %v1121_v45  ;;  %v1125_v53 = vcvt.s32.f32 %v1122_v46 }
 0x113   : > { %1679 = vst [vmem:[#allocation2 + $0x40] sm:$0xff] %v1647_v47  ;;  %1680 = vst [vmem:[#allocation2 + $0x48] sm:$0xff] %v1648_v49  ;;  %v1129_v54 = vcvt.s32.f32 %v1127_v50  ;;  %v1131_v57 = vcvt.s32.f32 %v1128_v51  ;;  %v1133_v37 = vshrl.u32 %v954_v29, 16  ;;  %v1134_v58 = vand.u32 65535, %v954_v29 }
 0x114   : > { %v1118_v59 = vmul.f32 65536.0, %v1117_v39  ;;  %v1124_v60 = vmul.f32 65536.0, %v1123_v30  ;;  %v492_v61 = vrot.slane %v3035_v24, %v3009_v13  ;;  %v506_v62 = vrot.slane %v478_v4, %v3009_v13 }
 0x115   : > { %v1130_v63 = vmul.f32 65536.0, %v1129_v54  ;;  %v1135_v0 = vcvt.s32.f32 %v1133_v37  ;;  %v1137_v1 = vcvt.s32.f32 %v1134_v58  ;;  %v3198_v2 = vrot.slane %v2345_v32, %v3009_v13 }
 0x116   : > { %v1120_v3 = vadd.f32 %v1119_v52, %v1118_v59  ;;  %v1126_v55 = vadd.f32 %v1125_v53, %v1124_v60  ;;  %v710_v7 = vrot.slane %v492_v61, %v3013_v15  ;;  %v718_v8 = vrot.slane %v506_v62, %v3013_v15 }
 0x117   : > { %v1132_v10 = vadd.f32 %v1131_v57, %v1130_v63  ;;  %v1136_v11 = vmul.f32 65536.0, %v1135_v0  ;;  %v714_v12 = vrot.slane %v492_v61, %v3015_v16  ;;  %v722_v24 = vrot.slane %v506_v62, %v3015_v16 }
 0x118   : > { %v1466_v4 = vmul.f32 %v3144_v6, %v1120_v3  ;;  %v1467_v17 = vmul.f32 %v3167_v41, %v1126_v55  ;;  %v891_v21 = vshrl.u32 %v710_v7, %v3011_v14  ;;  %v893_v5 = vshrl.u32 %v718_v8, %v3011_v14 }
 0x119   : > { %v1468_v38 = vmul.f32 %v3144_v6, %v1132_v10  ;;  %v1138_v56 = vadd.f32 %v1137_v1, %v1136_v11  ;;  %v892_v20 = vshrl.u32 %v714_v12, %v3011_v14  ;;  %v894_v25 = vshrl.u32 %v722_v24, %v3011_v14 }
 0x11a   : > { %v1595_v26 = vsub.f32 %v1466_v4, %v3150_v9  ;;  %v1596_v31 = vsub.f32 %v1467_v17, %v3173_v28  ;;  %v955_v33 = vand.u32 15, %v891_v21  ;;  %v957_v34 = vand.u32 15, %v893_v5 }
 0x11b   : > { %v1597_v35 = vsub.f32 %v1468_v38, %v3150_v9  ;;  %v1469_v36 = vmul.f32 %v3167_v41, %v1138_v56  ;;  %v956_v27 = vand.u32 15, %v892_v20  ;;  %v958_v43 = vand.u32 15, %v894_v25 }
 0x11c   : > { %v1139_v44 = vshrl.u32 %v955_v33, 16  ;;  %v1140_v40 = vand.u32 65535, %v955_v33  ;;  %v1151_v29 = vshrl.u32 %v957_v34, 16  ;;  %v1152_v48 = vand.u32 65535, %v957_v34 }
 0x11d   : > { %v1649_v42 = vpack.c.bf16 %v1597_v35, %v1595_v26  ;;  %v1598_v45 = vsub.f32 %v1469_v36, %v3173_v28  ;;  %v1145_v46 = vshrl.u32 %v956_v27, 16  ;;  %v1146_v47 = vand.u32 65535, %v956_v27 }
 0x11e   : > { %v1141_v49 = vcvt.s32.f32 %v1139_v44  ;;  %v1143_v50 = vcvt.s32.f32 %v1140_v40  ;;  %v1153_v51 = vcvt.s32.f32 %v1151_v29  ;;  %v1155_v32 = vcvt.s32.f32 %v1152_v48 }
 0x11f   : > { %1681 = vst [vmem:[#allocation2 + $0x50] sm:$0xff] %v1649_v42  ;;  %v1650_v39 = vpack.c.bf16 %v1598_v45, %v1596_v31  ;;  %v1147_v52 = vcvt.s32.f32 %v1145_v46  ;;  %v1149_v30 = vcvt.s32.f32 %v1146_v47  ;;  %v1157_v53 = vshrl.u32 %v958_v43, 16 }
 0x120   : > { %v1142_v54 = vmul.f32 65536.0, %v1141_v49  ;;  %v1154_v57 = vmul.f32 65536.0, %v1153_v51  ;;  %v1158_v37 = vand.u32 65535, %v958_v43  ;;  %v508_v58 = vcombine.high %v492_v61, %v492_v61 }
 0x121   : > { %1682 = vst [vmem:[#allocation2 + $0x58] sm:$0xff] %v1650_v39  ;;  %v1148_v59 = vmul.f32 65536.0, %v1147_v52  ;;  %v1159_v60 = vcvt.s32.f32 %v1157_v53  ;;  %v510_v63 = vcombine.high %v506_v62, %v506_v62  ;;  %v527_v0 = vcombine.high %v3198_v2, %v3198_v2 }
 0x122   : > { %v1144_v1 = vadd.f32 %v1143_v50, %v1142_v54  ;;  %v1156_v3 = vadd.f32 %v1155_v32, %v1154_v57  ;;  %v1161_v55 = vcvt.s32.f32 %v1158_v37  ;;  %v726_v7 = vrot.slane %v508_v58, %v3013_v15 }
 0x123   : > { %v1150_v8 = vadd.f32 %v1149_v30, %v1148_v59  ;;  %v1160_v10 = vmul.f32 65536.0, %v1159_v60  ;;  %v734_v11 = vrot.slane %v510_v63, %v3013_v15  ;;  %v730_v12 = vrot.slane %v508_v58, %v3015_v16 }
 0x124   : > { %v1470_v61 = vmul.f32 %v3144_v6, %v1144_v1  ;;  %v1472_v24 = vmul.f32 %v3144_v6, %v1156_v3  ;;  %v895_v62 = vshrl.u32 %v726_v7, %v3011_v14  ;;  %v738_v4 = vrot.slane %v510_v63, %v3015_v16 }
 0x125   : > { %v1162_v17 = vadd.f32 %v1161_v55, %v1160_v10  ;;  %v1471_v21 = vmul.f32 %v3167_v41, %v1150_v8  ;;  %v897_v5 = vshrl.u32 %v734_v11, %v3011_v14  ;;  %v896_v38 = vshrl.u32 %v730_v12, %v3011_v14 }
 0x126   : > { %v1599_v56 = vsub.f32 %v1470_v61, %v3150_v9  ;;  %v1601_v20 = vsub.f32 %v1472_v24, %v3150_v9  ;;  %v959_v25 = vand.u32 15, %v895_v62  ;;  %v898_v26 = vshrl.u32 %v738_v4, %v3011_v14 }
 0x127   : > { %v1473_v31 = vmul.f32 %v3167_v41, %v1162_v17  ;;  %v1600_v33 = vsub.f32 %v1471_v21, %v3173_v28  ;;  %v961_v34 = vand.u32 15, %v897_v5  ;;  %v960_v35 = vand.u32 15, %v896_v38 }
 0x128   : > { %v1651_v36 = vpack.c.bf16 %v1601_v20, %v1599_v56  ;;  %v1163_v27 = vshrl.u32 %v959_v25, 16  ;;  %v1164_v43 = vand.u32 65535, %v959_v25  ;;  %v962_v44 = vand.u32 15, %v898_v26 }
 0x129   : > { %v1602_v40 = vsub.f32 %v1473_v31, %v3173_v28  ;;  %v1175_v29 = vshrl.u32 %v961_v34, 16  ;;  %v1176_v48 = vand.u32 65535, %v961_v34  ;;  %v1169_v42 = vshrl.u32 %v960_v35, 16 }
 0x12a   : > { %1683 = vst [vmem:[#allocation2 + $0x60] sm:$0xff] %v1651_v36  ;;  %v1165_v45 = vcvt.s32.f32 %v1163_v27  ;;  %v1167_v46 = vcvt.s32.f32 %v1164_v43  ;;  %v1170_v47 = vand.u32 65535, %v960_v35  ;;  %v1181_v49 = vshrl.u32 %v962_v44, 16 }
 0x12b   : > { %v1652_v50 = vpack.c.bf16 %v1602_v40, %v1600_v33  ;;  %v1177_v51 = vcvt.s32.f32 %v1175_v29  ;;  %v1179_v32 = vcvt.s32.f32 %v1176_v48  ;;  %v1171_v39 = vcvt.s32.f32 %v1169_v42 }
 0x12c   : > { %v1166_v52 = vmul.f32 65536.0, %v1165_v45  ;;  %v1173_v30 = vcvt.s32.f32 %v1170_v47  ;;  %v1182_v53 = vand.u32 65535, %v962_v44  ;;  %v1183_v54 = vcvt.s32.f32 %v1181_v49 }
 0x12d   : > { %1684 = vst [vmem:[#allocation2 + $0x68] sm:$0xff] %v1652_v50  ;;  %v1178_v57 = vmul.f32 65536.0, %v1177_v51  ;;  %v1172_v37 = vmul.f32 65536.0, %v1171_v39  ;;  %v535_v58 = vrot.slane %v3198_v2, %v3009_v13  ;;  %v549_v59 = vrot.slane %v527_v0, %v3009_v13 }
 0x12e   : > { %v1168_v60 = vadd.f32 %v1167_v46, %v1166_v52  ;;  %v1184_v63 = vmul.f32 65536.0, %v1183_v54  ;;  %v1185_v1 = vcvt.s32.f32 %v1182_v53  ;;  %v1404_v3 = vcombine.high %v3019_v18, %v3019_v18 }
 0x12f   : > { %v1180_v55 = vadd.f32 %v1179_v32, %v1178_v57  ;;  %v1174_v7 = vadd.f32 %v1173_v30, %v1172_v37  ;;  %v742_v8 = vrot.slane %v535_v58, %v3013_v15  ;;  %v750_v10 = vrot.slane %v549_v59, %v3013_v15 }
 0x130   : > { %v1474_v11 = vmul.f32 %v3144_v6, %v1168_v60  ;;  %v1186_v12 = vadd.f32 %v1185_v1, %v1184_v63  ;;  %v3243_v61 = vrot.slane %v1404_v3, %v3013_v15  ;;  %v1533_v2 = vcombine.high %v3022_v19, %v3022_v19 }
 0x131   : > { %v1476_v0 = vmul.f32 %v3144_v6, %v1180_v55  ;;  %v1475_v24 = vmul.f32 %v3167_v41, %v1174_v7  ;;  %v899_v18 = vshrl.u32 %v742_v8, %v3011_v14  ;;  %v901_v62 = vshrl.u32 %v750_v10, %v3011_v14 }
 0x132   : > { %v1603_v4 = vsub.f32 %v1474_v11, %v3150_v9  ;;  %v1477_v17 = vmul.f32 %v3167_v41, %v1186_v12  ;;  %v3254_v21 = vrot.slane %v1533_v2, %v3013_v15  ;;  %v746_v5 = vrot.slane %v535_v58, %v3015_v16 }
 0x133   : > { %v1605_v38 = vsub.f32 %v1476_v0, %v3150_v9  ;;  %v1604_v19 = vsub.f32 %v1475_v24, %v3173_v28  ;;  %v963_v6 = vand.u32 15, %v899_v18  ;;  %v965_v56 = vand.u32 15, %v901_v62 }
 0x134   : > { %v1606_v20 = vsub.f32 %v1477_v17, %v3173_v28  ;;  %v754_v25 = vrot.slane %v549_v59, %v3015_v16  ;;  %v900_v26 = vshrl.u32 %v746_v5, %v3011_v14  ;;  %v3263_v31 = vrot.slane %v1404_v3, %v3015_v16 }
 0x135   : > { %v1653_v41 = vpack.c.bf16 %v1605_v38, %v1603_v4  ;;  %v1187_v33 = vshrl.u32 %v963_v6, 16  ;;  %v1188_v34 = vand.u32 65535, %v963_v6  ;;  %v1199_v35 = vshrl.u32 %v965_v56, 16 }
 0x136   : > { %v1654_v36 = vpack.c.bf16 %v1606_v20, %v1604_v19  ;;  %v1200_v27 = vand.u32 65535, %v965_v56  ;;  %v902_v9 = vshrl.u32 %v754_v25, %v3011_v14  ;;  %v964_v43 = vand.u32 15, %v900_v26 }
 0x137   : > { %1685 = vst [vmem:[#allocation2 + $0x70] sm:$0xff] %v1653_v41  ;;  %v1189_v44 = vcvt.s32.f32 %v1187_v33  ;;  %v1191_v40 = vcvt.s32.f32 %v1188_v34  ;;  %v1201_v28 = vcvt.s32.f32 %v1199_v35  ;;  %v3267_v29 = vrot.slane %v1533_v2, %v3015_v16  ;;  %v2347_v33 = vld [vmem:[%s2978_s28 + $0x24] ss:$8 sps:$4 sm:$0xff]  }
 0x138   : > { %1686 = vst [vmem:[#allocation2 + $0x78] sm:$0xff] %v1654_v36  ;;  %v1203_v48 = vcvt.s32.f32 %v1200_v27  ;;  %v966_v42 = vand.u32 15, %v902_v9  ;;  %v1193_v45 = vshrl.u32 %v964_v43, 16  ;;  %v1194_v46 = vand.u32 65535, %v964_v43 }
 0x139   : > { %v1190_v47 = vmul.f32 65536.0, %v1189_v44  ;;  %v1202_v49 = vmul.f32 65536.0, %v1201_v28  ;;  %v557_v50 = vcombine.high %v535_v58, %v535_v58  ;;  %v559_v51 = vcombine.high %v549_v59, %v549_v59  ;;  %v2348_v28 = vld [vmem:[%s2978_s28 + $0x30] ss:$8 sps:$4 sm:$0xff]  }
 0x13a   : > { %v1195_v32 = vcvt.s32.f32 %v1193_v45  ;;  %v1197_v39 = vcvt.s32.f32 %v1194_v46  ;;  %v1205_v52 = vshrl.u32 %v966_v42, 16  ;;  %v1206_v30 = vand.u32 65535, %v966_v42 }
 0x13b   : > { %v1192_v53 = vadd.f32 %v1191_v40, %v1190_v47  ;;  %v1204_v54 = vadd.f32 %v1203_v48, %v1202_v49  ;;  %v758_v57 = vrot.slane %v557_v50, %v3013_v15  ;;  %v766_v37 = vrot.slane %v559_v51, %v3013_v15 }
 0x13c   : > { %v1196_v60 = vmul.f32 65536.0, %v1195_v32  ;;  %v1207_v63 = vcvt.s32.f32 %v1205_v52  ;;  %v1209_v1 = vcvt.s32.f32 %v1206_v30  ;;  %v762_v3 = vrot.slane %v557_v50, %v3015_v16 }
 0x13d   : > { %v1478_v55 = vmul.f32 %v3243_v61, %v1192_v53  ;;  %v1480_v58 = vmul.f32 %v3243_v61, %v1204_v54  ;;  %v903_v59 = vshrl.u32 %v758_v57, %v3011_v14  ;;  %v905_v7 = vshrl.u32 %v766_v37, %v3011_v14 }
 0x13e   : > { %v1198_v8 = vadd.f32 %v1197_v39, %v1196_v60  ;;  %v1208_v10 = vmul.f32 65536.0, %v1207_v63  ;;  %v770_v11 = vrot.slane %v559_v51, %v3015_v16  ;;  %v904_v12 = vshrl.u32 %v762_v3, %v3011_v14 }
 0x13f   : > { %v1607_v2 = vsub.f32 %v1478_v55, %v3254_v21  ;;  %v1609_v0 = vsub.f32 %v1480_v58, %v3254_v21  ;;  %v967_v24 = vand.u32 15, %v903_v59  ;;  %v969_v18 = vand.u32 15, %v905_v7 }
 0x140   : > { %v1210_v62 = vadd.f32 %v1209_v1, %v1208_v10  ;;  %v1479_v4 = vmul.f32 %v3263_v31, %v1198_v8  ;;  %v906_v17 = vshrl.u32 %v770_v11, %v3011_v14  ;;  %v968_v5 = vand.u32 15, %v904_v12 }
 0x141   : > { %v1655_v38 = vpack.c.bf16 %v1609_v0, %v1607_v2  ;;  %v1211_v19 = vshrl.u32 %v967_v24, 16  ;;  %v1212_v6 = vand.u32 65535, %v967_v24  ;;  %v1223_v56 = vshrl.u32 %v969_v18, 16 }
 0x142   : > { %v1481_v20 = vmul.f32 %v3263_v31, %v1210_v62  ;;  %v1608_v25 = vsub.f32 %v1479_v4, %v3267_v29  ;;  %v1224_v26 = vand.u32 65535, %v969_v18  ;;  %v970_v41 = vand.u32 15, %v906_v17 }
 0x143   : > { %1687 = vst [vmem:[#allocation2 + $0x80] sm:$0xff] %v1655_v38  ;;  %v1213_v34 = vcvt.s32.f32 %v1211_v19  ;;  %v1215_v35 = vcvt.s32.f32 %v1212_v6  ;;  %v1225_v36 = vcvt.s32.f32 %v1223_v56  ;;  %v1217_v27 = vshrl.u32 %v968_v5, 16 }
 0x144   : > { %v1610_v9 = vsub.f32 %v1481_v20, %v3267_v29  ;;  %v1227_v43 = vcvt.s32.f32 %v1224_v26  ;;  %v1218_v44 = vand.u32 65535, %v968_v5  ;;  %v1229_v40 = vshrl.u32 %v970_v41, 16 }
 0x145   : > { %v1214_v48 = vmul.f32 65536.0, %v1213_v34  ;;  %v1226_v42 = vmul.f32 65536.0, %v1225_v36  ;;  %v1219_v45 = vcvt.s32.f32 %v1217_v27  ;;  %v1230_v46 = vand.u32 65535, %v970_v41 }
 0x146   : > { %v1656_v47 = vpack.c.bf16 %v1610_v9, %v1608_v25  ;;  %v1221_v49 = vcvt.s32.f32 %v1218_v44  ;;  %v1231_v50 = vcvt.s32.f32 %v1229_v40  ;;  %v526_v51 = vrot.slane %v2347_v33, %v3009_v13 }
 0x147   : > { %v1216_v32 = vadd.f32 %v1215_v35, %v1214_v48  ;;  %v1228_v39 = vadd.f32 %v1227_v43, %v1226_v42  ;;  %v1220_v52 = vmul.f32 65536.0, %v1219_v45  ;;  %v1233_v30 = vcvt.s32.f32 %v1230_v46 }
 0x148   : > { %1688 = vst [vmem:[#allocation2 + $0x88] sm:$0xff] %v1656_v47  ;;  %v1232_v53 = vmul.f32 65536.0, %v1231_v50  ;;  %v528_v54 = vcombine.high %v526_v51, %v526_v51  ;;  %v542_v57 = vrot.slane %v526_v51, %v3009_v13  ;;  %v3290_v37 = vrot.slane %v2348_v28, %v3009_v13 }
 0x149   : > { %v1482_v60 = vmul.f32 %v3243_v61, %v1216_v32  ;;  %v1484_v63 = vmul.f32 %v3243_v61, %v1228_v39  ;;  %v1222_v1 = vadd.f32 %v1221_v49, %v1220_v52  ;;  %v3296_v3 = vcombine.high %v3029_v22, %v3029_v22 }
 0x14a   : > { %v1234_v55 = vadd.f32 %v1233_v30, %v1232_v53  ;;  %v556_v58 = vrot.slane %v528_v54, %v3009_v13  ;;  %v774_v59 = vrot.slane %v542_v57, %v3013_v15  ;;  %v778_v7 = vrot.slane %v542_v57, %v3015_v16 }
 0x14b   : > { %v1611_v8 = vsub.f32 %v1482_v60, %v3254_v21  ;;  %v1613_v10 = vsub.f32 %v1484_v63, %v3254_v21  ;;  %v1483_v11 = vmul.f32 %v3263_v31, %v1222_v1  ;;  %v3304_v12 = vcombine.high %v542_v57, %v542_v57 }
 0x14c   : > { %v1485_v2 = vmul.f32 %v3263_v31, %v1234_v55  ;;  %v782_v22 = vrot.slane %v556_v58, %v3013_v15  ;;  %v907_v0 = vshrl.u32 %v774_v59, %v3011_v14  ;;  %v786_v24 = vrot.slane %v556_v58, %v3015_v16 }
 0x14d   : > { %v1657_v18 = vpack.c.bf16 %v1613_v10, %v1611_v8  ;;  %v1612_v62 = vsub.f32 %v1483_v11, %v3267_v29  ;;  %v908_v4 = vshrl.u32 %v778_v7, %v3011_v14  ;;  %v560_v17 = vcombine.high %v556_v58, %v556_v58 }
 0x14e   : > { %v1614_v5 = vsub.f32 %v1485_v2, %v3267_v29  ;;  %v909_v38 = vshrl.u32 %v782_v22, %v3011_v14  ;;  %v971_v19 = vand.u32 15, %v907_v0  ;;  %v910_v6 = vshrl.u32 %v786_v24, %v3011_v14 }
 0x14f   : > { %1689 = vst [vmem:[#allocation2 + $0x90] sm:$0xff] %v1657_v18  ;;  %v972_v56 = vand.u32 15, %v908_v4  ;;  %v790_v20 = vrot.slane %v3304_v12, %v3013_v15  ;;  %v798_v25 = vrot.slane %v560_v17, %v3013_v15  ;;  %v794_v26 = vrot.slane %v3304_v12, %v3015_v16 }
 0x150   : > { %v1658_v41 = vpack.c.bf16 %v1614_v5, %v1612_v62  ;;  %v973_v33 = vand.u32 15, %v909_v38  ;;  %v1235_v34 = vshrl.u32 %v971_v19, 16  ;;  %v1236_v35 = vand.u32 65535, %v971_v19 }
 0x151   : > { %v974_v36 = vand.u32 15, %v910_v6  ;;  %v1241_v27 = vshrl.u32 %v972_v56, 16  ;;  %v1242_v9 = vand.u32 65535, %v972_v56  ;;  %v911_v43 = vshrl.u32 %v790_v20, %v3011_v14 }
 0x152   : > { %1690 = vst [vmem:[#allocation2 + $0x98] sm:$0xff] %v1658_v41  ;;  %v1237_v44 = vcvt.s32.f32 %v1235_v34  ;;  %v1239_v40 = vcvt.s32.f32 %v1236_v35  ;;  %v1247_v28 = vshrl.u32 %v973_v33, 16  ;;  %v1248_v48 = vand.u32 65535, %v973_v33 }
 0x153   : > { %v1243_v42 = vcvt.s32.f32 %v1241_v27  ;;  %v1245_v45 = vcvt.s32.f32 %v1242_v9  ;;  %v1253_v46 = vshrl.u32 %v974_v36, 16  ;;  %v1254_v47 = vand.u32 65535, %v974_v36 }
 0x154   : > { %v1238_v49 = vmul.f32 65536.0, %v1237_v44  ;;  %v1249_v50 = vcvt.s32.f32 %v1247_v28  ;;  %v1251_v51 = vcvt.s32.f32 %v1248_v48  ;;  %v913_v32 = vshrl.u32 %v798_v25, %v3011_v14 }
 0x155   : > { %v1244_v39 = vmul.f32 65536.0, %v1243_v42  ;;  %v1255_v52 = vcvt.s32.f32 %v1253_v46  ;;  %v1257_v30 = vcvt.s32.f32 %v1254_v47  ;;  %v975_v53 = vand.u32 15, %v911_v43 }
 0x156   : > { %v1240_v54 = vadd.f32 %v1239_v40, %v1238_v49  ;;  %v1250_v57 = vmul.f32 65536.0, %v1249_v50  ;;  %v977_v60 = vand.u32 15, %v913_v32  ;;  %v802_v63 = vrot.slane %v560_v17, %v3015_v16 }
 0x157   : > { %v1246_v1 = vadd.f32 %v1245_v45, %v1244_v39  ;;  %v1256_v55 = vmul.f32 65536.0, %v1255_v52  ;;  %v1259_v58 = vshrl.u32 %v975_v53, 16  ;;  %v1260_v59 = vand.u32 65535, %v975_v53 }
 0x158   : > { %v1252_v7 = vadd.f32 %v1251_v51, %v1250_v57  ;;  %v1486_v8 = vmul.f32 %v3243_v61, %v1240_v54  ;;  %v1271_v10 = vshrl.u32 %v977_v60, 16  ;;  %v1272_v11 = vand.u32 65535, %v977_v60 }
 0x159   : > { %v1258_v12 = vadd.f32 %v1257_v30, %v1256_v55  ;;  %v1487_v2 = vmul.f32 %v3263_v31, %v1246_v1  ;;  %v1261_v22 = vcvt.s32.f32 %v1259_v58  ;;  %v1263_v0 = vcvt.s32.f32 %v1260_v59 }
 0x15a   : > { %v1488_v24 = vmul.f32 %v3243_v61, %v1252_v7  ;;  %v1615_v18 = vsub.f32 %v1486_v8, %v3254_v21  ;;  %v1273_v62 = vcvt.s32.f32 %v1271_v10  ;;  %v1275_v4 = vcvt.s32.f32 %v1272_v11 }
 0x15b   : > { %v1489_v17 = vmul.f32 %v3263_v31, %v1258_v12  ;;  %v1616_v5 = vsub.f32 %v1487_v2, %v3267_v29  ;;  %v1262_v38 = vmul.f32 65536.0, %v1261_v22  ;;  %v912_v19 = vshrl.u32 %v794_v26, %v3011_v14 }
 0x15c   : > { %v1617_v6 = vsub.f32 %v1488_v24, %v3254_v21  ;;  %v1274_v56 = vmul.f32 65536.0, %v1273_v62  ;;  %v914_v20 = vshrl.u32 %v802_v63, %v3011_v14  ;;  %v577_v25 = vcombine.high %v3290_v37, %v3290_v37 }
 0x15d   : > { %v1618_v41 = vsub.f32 %v1489_v17, %v3267_v29  ;;  %v1264_v33 = vadd.f32 %v1263_v0, %v1262_v38  ;;  %v976_v34 = vand.u32 15, %v912_v19  ;;  %v3337_v35 = vrot.slane %v3290_v37, %v3009_v13 }
 0x15e   : > { %v1659_v36 = vpack.c.bf16 %v1617_v6, %v1615_v18  ;;  %v1276_v27 = vadd.f32 %v1275_v4, %v1274_v56  ;;  %v978_v9 = vand.u32 15, %v914_v20  ;;  %v3340_v26 = vrot.slane %v577_v25, %v3009_v13 }
 0x15f   : > { %v1660_v43 = vpack.c.bf16 %v1618_v41, %v1616_v5  ;;  %v1490_v44 = vmul.f32 %v3243_v61, %v1264_v33  ;;  %v1265_v40 = vshrl.u32 %v976_v34, 16  ;;  %v1266_v28 = vand.u32 65535, %v976_v34  ;;  %v2350_v33 = vld [vmem:[%s2978_s28 + $0x34] ss:$8 sps:$4 sm:$0xff]  }
 0x160   : > { %1691 = vst [vmem:[#allocation2 + $0xa0] sm:$0xff] %v1659_v36  ;;  %v1492_v48 = vmul.f32 %v3243_v61, %v1276_v27  ;;  %v1277_v42 = vshrl.u32 %v978_v9, 16  ;;  %v1278_v45 = vand.u32 65535, %v978_v9  ;;  %v806_v37 = vrot.slane %v3337_v35, %v3013_v15 }
 0x161   : > { %1692 = vst [vmem:[#allocation2 + $0xa8] sm:$0xff] %v1660_v43  ;;  %v1619_v46 = vsub.f32 %v1490_v44, %v3254_v21  ;;  %v1267_v47 = vcvt.s32.f32 %v1265_v40  ;;  %v1269_v49 = vcvt.s32.f32 %v1266_v28  ;;  %v814_v50 = vrot.slane %v3340_v26, %v3013_v15 }
 0x162   : > { %v1621_v51 = vsub.f32 %v1492_v48, %v3254_v21  ;;  %v1279_v32 = vcvt.s32.f32 %v1277_v42  ;;  %v1281_v39 = vcvt.s32.f32 %v1278_v45  ;;  %v915_v52 = vshrl.u32 %v806_v37, %v3011_v14 }
 0x163   : > { %v1268_v61 = vmul.f32 65536.0, %v1267_v47  ;;  %v917_v30 = vshrl.u32 %v814_v50, %v3011_v14  ;;  %v3354_v53 = vrot.slane %v3296_v3, %v3013_v15  ;;  %v810_v63 = vrot.slane %v3337_v35, %v3015_v16 }
 0x164   : > { %v1661_v54 = vpack.c.bf16 %v1621_v51, %v1619_v46  ;;  %v1280_v57 = vmul.f32 65536.0, %v1279_v32  ;;  %v979_v60 = vand.u32 15, %v915_v52  ;;  %v1534_v21 = vcombine.high %v3032_v23, %v3032_v23 }
 0x165   : > { %v1270_v1 = vadd.f32 %v1269_v49, %v1268_v61  ;;  %v981_v55 = vand.u32 15, %v917_v30  ;;  %v818_v58 = vrot.slane %v3340_v26, %v3015_v16  ;;  %v916_v10 = vshrl.u32 %v810_v63, %v3011_v14 }
 0x166   : > { %1693 = vst [vmem:[#allocation2 + $0xb0] sm:$0xff] %v1661_v54  ;;  %v1282_v59 = vadd.f32 %v1281_v39, %v1280_v57  ;;  %v1283_v7 = vshrl.u32 %v979_v60, 16  ;;  %v1284_v8 = vand.u32 65535, %v979_v60  ;;  %v3369_v25 = vrot.slane %v1534_v21, %v3013_v15 }
 0x167   : > { %v1491_v11 = vmul.f32 %v3263_v31, %v1270_v1  ;;  %v1295_v12 = vshrl.u32 %v981_v55, 16  ;;  %v1296_v2 = vand.u32 65535, %v981_v55  ;;  %v918_v22 = vshrl.u32 %v818_v58, %v3011_v14 }
 0x168   : > { %v1493_v0 = vmul.f32 %v3263_v31, %v1282_v59  ;;  %v1285_v24 = vcvt.s32.f32 %v1283_v7  ;;  %v1287_v23 = vcvt.s32.f32 %v1284_v8  ;;  %v980_v18 = vand.u32 15, %v916_v10 }
 0x169   : > { %v1620_v62 = vsub.f32 %v1491_v11, %v3267_v29  ;;  %v1297_v4 = vcvt.s32.f32 %v1295_v12  ;;  %v1299_v17 = vcvt.s32.f32 %v1296_v2  ;;  %v982_v5 = vand.u32 15, %v918_v22 }
 0x16a   : > { %v1622_v38 = vsub.f32 %v1493_v0, %v3267_v29  ;;  %v1286_v19 = vmul.f32 65536.0, %v1285_v24  ;;  %v1289_v6 = vshrl.u32 %v980_v18, 16  ;;  %v1290_v56 = vand.u32 65535, %v980_v18 }
 0x16b   : > { %v1298_v20 = vmul.f32 65536.0, %v1297_v4  ;;  %v1301_v41 = vshrl.u32 %v982_v5, 16  ;;  %v1302_v31 = vand.u32 65535, %v982_v5  ;;  %v3374_v29 = vrot.slane %v3296_v3, %v3015_v16 }
 0x16c   : > { %v1662_v34 = vpack.c.bf16 %v1622_v38, %v1620_v62  ;;  %v1288_v36 = vadd.f32 %v1287_v23, %v1286_v19  ;;  %v1291_v27 = vcvt.s32.f32 %v1289_v6  ;;  %v1293_v9 = vcvt.s32.f32 %v1290_v56 }
 0x16d   : > { %v1300_v43 = vadd.f32 %v1299_v17, %v1298_v20  ;;  %v1303_v44 = vcvt.s32.f32 %v1301_v41  ;;  %v1305_v40 = vcvt.s32.f32 %v1302_v31  ;;  %v607_v42 = vcombine.high %v3337_v35, %v3337_v35 }
 0x16e   : > { %1694 = vst [vmem:[#allocation2 + $0xb8] sm:$0xff] %v1662_v34  ;;  %v1494_v28 = vmul.f32 %v3354_v53, %v1288_v36  ;;  %v1292_v48 = vmul.f32 65536.0, %v1291_v27  ;;  %v609_v45 = vcombine.high %v3340_v26, %v3340_v26  ;;  %v3383_v47 = vrot.slane %v1534_v21, %v3015_v16 }
 0x16f   : > { %v1496_v37 = vmul.f32 %v3354_v53, %v1300_v43  ;;  %v1304_v46 = vmul.f32 65536.0, %v1303_v44  ;;  %v576_v49 = vrot.slane %v2350_v33, %v3009_v13  ;;  %v822_v51 = vrot.slane %v607_v42, %v3013_v15 }
 0x170   : > { %v1623_v3 = vsub.f32 %v1494_v28, %v3369_v25  ;;  %v1294_v50 = vadd.f32 %v1293_v9, %v1292_v48  ;;  %v830_v32 = vrot.slane %v609_v45, %v3013_v15  ;;  %v826_v26 = vrot.slane %v607_v42, %v3015_v16 }
 0x171   : > { %v1625_v35 = vsub.f32 %v1496_v37, %v3369_v25  ;;  %v1306_v39 = vadd.f32 %v1305_v40, %v1304_v46  ;;  %v834_v52 = vrot.slane %v609_v45, %v3015_v16  ;;  %v919_v30 = vshrl.u32 %v822_v51, %v3011_v14 }
 0x172   : > { %v1495_v61 = vmul.f32 %v3374_v29, %v1294_v50  ;;  %v921_v54 = vshrl.u32 %v830_v32, %v3011_v14  ;;  %v578_v57 = vcombine.high %v576_v49, %v576_v49  ;;  %v920_v1 = vshrl.u32 %v826_v26, %v3011_v14 }
 0x173   : > { %v1663_v60 = vpack.c.bf16 %v1625_v35, %v1623_v3  ;;  %v1497_v63 = vmul.f32 %v3374_v29, %v1306_v39  ;;  %v922_v55 = vshrl.u32 %v834_v52, %v3011_v14  ;;  %v983_v58 = vand.u32 15, %v919_v30 }
 0x174   : > { %v1624_v21 = vsub.f32 %v1495_v61, %v3383_v47  ;;  %v985_v59 = vand.u32 15, %v921_v54  ;;  %v3400_v7 = vrot.slane %v576_v49, %v3009_v13  ;;  %v984_v10 = vand.u32 15, %v920_v1 }
 0x175   : > { %1695 = vst [vmem:[#allocation2 + $0xc0] sm:$0xff] %v1663_v60  ;;  %v1626_v8 = vsub.f32 %v1497_v63, %v3383_v47  ;;  %v986_v11 = vand.u32 15, %v922_v55  ;;  %v3404_v12 = vrot.slane %v578_v57, %v3009_v13  ;;  %v1307_v2 = vshrl.u32 %v983_v58, 16 }
 0x176   : > { %v1308_v22 = vand.u32 65535, %v983_v58  ;;  %v1319_v0 = vshrl.u32 %v985_v59, 16  ;;  %v1320_v24 = vand.u32 65535, %v985_v59  ;;  %v1313_v18 = vshrl.u32 %v984_v10, 16 }
 0x177   : > { %v1664_v23 = vpack.c.bf16 %v1626_v8, %v1624_v21  ;;  %v1314_v62 = vand.u32 65535, %v984_v10  ;;  %v1325_v4 = vshrl.u32 %v986_v11, 16  ;;  %v1309_v17 = vcvt.s32.f32 %v1307_v2 }
 0x178   : > { %v1311_v5 = vcvt.s32.f32 %v1308_v22  ;;  %v1321_v38 = vcvt.s32.f32 %v1319_v0  ;;  %v1323_v19 = vcvt.s32.f32 %v1320_v24  ;;  %v1315_v6 = vcvt.s32.f32 %v1313_v18 }
 0x179   : > { %1696 = vst [vmem:[#allocation2 + $0xc8] sm:$0xff] %v1664_v23  ;;  %v1317_v56 = vcvt.s32.f32 %v1314_v62  ;;  %v1326_v20 = vand.u32 65535, %v986_v11  ;;  %v1327_v41 = vcvt.s32.f32 %v1325_v4  ;;  %v1310_v31 = vmul.f32 65536.0, %v1309_v17 }
 0x17a   : > { %v1322_v13 = vmul.f32 65536.0, %v1321_v38  ;;  %v838_v33 = vrot.slane %v3400_v7, %v3013_v15  ;;  %v846_v34 = vrot.slane %v3404_v12, %v3013_v15  ;;  %v1316_v36 = vmul.f32 65536.0, %v1315_v6 }
 0x17b   : > { %v1328_v27 = vmul.f32 65536.0, %v1327_v41  ;;  %v1329_v9 = vcvt.s32.f32 %v1326_v20  ;;  %v842_v43 = vrot.slane %v3400_v7, %v3015_v16  ;;  %v1312_v44 = vadd.f32 %v1311_v5, %v1310_v31 }
 0x17c   : > { %v1324_v40 = vadd.f32 %v1323_v19, %v1322_v13  ;;  %v923_v28 = vshrl.u32 %v838_v33, %v3011_v14  ;;  %v925_v48 = vshrl.u32 %v846_v34, %v3011_v14  ;;  %v1318_v42 = vadd.f32 %v1317_v56, %v1316_v36 }
 0x17d   : > { %v1330_v45 = vadd.f32 %v1329_v9, %v1328_v27  ;;  %v850_v37 = vrot.slane %v3404_v12, %v3015_v16  ;;  %v924_v46 = vshrl.u32 %v842_v43, %v3011_v14  ;;  %v1498_v49 = vmul.f32 %v3354_v53, %v1312_v44 }
 0x17e   : > { %v1500_v3 = vmul.f32 %v3354_v53, %v1324_v40  ;;  %v987_v50 = vand.u32 15, %v923_v28  ;;  %v989_v51 = vand.u32 15, %v925_v48  ;;  %v1499_v32 = vmul.f32 %v3374_v29, %v1318_v42 }
 0x17f   : > { %v1501_v35 = vmul.f32 %v3374_v29, %v1330_v45  ;;  %v926_v39 = vshrl.u32 %v850_v37, %v3011_v14  ;;  %v988_v26 = vand.u32 15, %v924_v46  ;;  %v1627_v52 = vsub.f32 %v1498_v49, %v3369_v25 }
 0x180   : > { %v1629_v61 = vsub.f32 %v1500_v3, %v3369_v25  ;;  %v1331_v30 = vshrl.u32 %v987_v50, 16  ;;  %v1332_v54 = vand.u32 65535, %v987_v50  ;;  %v1628_v57 = vsub.f32 %v1499_v32, %v3383_v47 }
 0x181   : > { %v1630_v60 = vsub.f32 %v1501_v35, %v3383_v47  ;;  %v1343_v63 = vshrl.u32 %v989_v51, 16  ;;  %v1344_v1 = vand.u32 65535, %v989_v51  ;;  %v990_v59 = vand.u32 15, %v926_v39 }
 0x182   : > { %v1665_v55 = vpack.c.bf16 %v1629_v61, %v1627_v52  ;;  %v1333_v21 = vcvt.s32.f32 %v1331_v30  ;;  %v1335_v58 = vcvt.s32.f32 %v1332_v54  ;;  %v1337_v2 = vshrl.u32 %v988_v26, 16 }
 0x183   : > { %v1666_v8 = vpack.c.bf16 %v1630_v60, %v1628_v57  ;;  %v1345_v10 = vcvt.s32.f32 %v1343_v63  ;;  %v1347_v11 = vcvt.s32.f32 %v1344_v1  ;;  %v1338_v0 = vand.u32 65535, %v988_v26 }
 0x184   : > { %1697 = vst [vmem:[#allocation2 + $0xd0] sm:$0xff] %v1665_v55  ;;  %v1334_v22 = vmul.f32 65536.0, %v1333_v21  ;;  %v1349_v24 = vshrl.u32 %v990_v59, 16  ;;  %v1350_v23 = vand.u32 65535, %v990_v59  ;;  %v1339_v62 = vcvt.s32.f32 %v1337_v2 }
 0x185   : > { %1698 = vst [vmem:[#allocation2 + $0xd8] sm:$0xff] %v1666_v8  ;;  %v1346_v18 = vmul.f32 65536.0, %v1345_v10  ;;  %v608_v4 = vcombine.high %v3400_v7, %v3400_v7  ;;  %v610_v17 = vcombine.high %v3404_v12, %v3404_v12  ;;  %v1341_v38 = vcvt.s32.f32 %v1338_v0 }
 0x186   : > { %v1336_v5 = vadd.f32 %v1335_v58, %v1334_v22  ;;  %v1351_v19 = vcvt.s32.f32 %v1349_v24  ;;  %v1353_v6 = vcvt.s32.f32 %v1350_v23  ;;  %v1340_v20 = vmul.f32 65536.0, %v1339_v62 }
 0x187   : > { %v1348_v56 = vadd.f32 %v1347_v11, %v1346_v18  ;;  %v854_v41 = vrot.slane %v608_v4, %v3013_v15  ;;  %v862_v31 = vrot.slane %v610_v17, %v3013_v15  ;;  %v858_v34 = vrot.slane %v608_v4, %v3015_v16 }
 0x188   : > { %v1502_v13 = vmul.f32 %v3354_v53, %v1336_v5  ;;  %v1352_v33 = vmul.f32 65536.0, %v1351_v19  ;;  %v866_v7 = vrot.slane %v610_v17, %v3015_v16  ;;  %v1342_v12 = vadd.f32 %v1341_v38, %v1340_v20 }
 0x189   : > { %v1504_v36 = vmul.f32 %v3354_v53, %v1348_v56  ;;  %v927_v27 = vshrl.u32 %v854_v41, %v3011_v14  ;;  %v929_v9 = vshrl.u32 %v862_v31, %v3011_v14  ;;  %v928_v40 = vshrl.u32 %v858_v34, %v3011_v14 }
 0x18a   : > { %v1631_v43 = vsub.f32 %v1502_v13, %v3369_v25  ;;  %v1354_v44 = vadd.f32 %v1353_v6, %v1352_v33  ;;  %v930_v15 = vshrl.u32 %v866_v7, %v3011_v14  ;;  %v1503_v48 = vmul.f32 %v3374_v29, %v1342_v12 }
 0x18b   : > { %v1633_v28 = vsub.f32 %v1504_v36, %v3369_v25  ;;  %v991_v42 = vand.u32 15, %v927_v27  ;;  %v993_v16 = vand.u32 15, %v929_v9  ;;  %v992_v37 = vand.u32 15, %v928_v40 }
 0x18c   : > { %v1505_v45 = vmul.f32 %v3374_v29, %v1354_v44  ;;  %v994_v46 = vand.u32 15, %v930_v15  ;;  %v1632_v3 = vsub.f32 %v1503_v48, %v3383_v47 }
 0x18d   : > { %v1667_v49 = vpack.c.bf16 %v1633_v28, %v1631_v43  ;;  %v1355_v50 = vshrl.u32 %v991_v42, 16  ;;  %v1356_v51 = vand.u32 65535, %v991_v42  ;;  %v1367_v35 = vshrl.u32 %v993_v16, 16 }
 0x18e   : > { %v1634_v32 = vsub.f32 %v1505_v45, %v3383_v47  ;;  %v1368_v39 = vand.u32 65535, %v993_v16  ;;  %v1361_v14 = vshrl.u32 %v992_v37, 16  ;;  %v1362_v61 = vand.u32 65535, %v992_v37 }
 0x18f   : > { %1699 = vst [vmem:[#allocation2 + $0xe0] sm:$0xff] %v1667_v49  ;;  %v1357_v26 = vcvt.s32.f32 %v1355_v50  ;;  %v1359_v52 = vcvt.s32.f32 %v1356_v51  ;;  %v1373_v30 = vshrl.u32 %v994_v46, 16  ;;  %v1369_v57 = vcvt.s32.f32 %v1367_v35 }
 0x190   : > { %v1668_v54 = vpack.c.bf16 %v1634_v32, %v1632_v3  ;;  %v1371_v60 = vcvt.s32.f32 %v1368_v39  ;;  %v1363_v63 = vcvt.s32.f32 %v1361_v14  ;;  %v1365_v55 = vcvt.s32.f32 %v1362_v61 }
 0x191   : > { %v1358_v1 = vmul.f32 65536.0, %v1357_v26  ;;  %v1374_v21 = vand.u32 65535, %v994_v46  ;;  %v1375_v58 = vcvt.s32.f32 %v1373_v30  ;;  %v1370_v59 = vmul.f32 65536.0, %v1369_v57 }
 0x192   : > { %1700 = vst [vmem:[#allocation2 + $0xe8] sm:$0xff] %v1668_v54  ;;  %v1364_v8 = vmul.f32 65536.0, %v1363_v63 }
 0x193   : > { %v1360_v10 = vadd.f32 %v1359_v52, %v1358_v1  ;;  %v1376_v11 = vmul.f32 65536.0, %v1375_v58  ;;  %v1377_v2 = vcvt.s32.f32 %v1374_v21  ;;  %v1372_v22 = vadd.f32 %v1371_v60, %v1370_v59 }
 0x194   : > { %v1366_v0 = vadd.f32 %v1365_v55, %v1364_v8 }
 0x195   : > { %v1506_v24 = vmul.f32 %v3354_v53, %v1360_v10  ;;  %v1378_v23 = vadd.f32 %v1377_v2, %v1376_v11  ;;  %v1508_v18 = vmul.f32 %v3354_v53, %v1372_v22 }
 0x196   : > { %v1507_v62 = vmul.f32 %v3374_v29, %v1366_v0 }
 0x197   : > { %v1635_v4 = vsub.f32 %v1506_v24, %v3369_v25  ;;  %v1509_v17 = vmul.f32 %v3374_v29, %v1378_v23  ;;  %v1637_v5 = vsub.f32 %v1508_v18, %v3369_v25 }
 0x198   : > { %v1636_v38 = vsub.f32 %v1507_v62, %v3383_v47 }
 0x199   : > { %v1638_v19 = vsub.f32 %v1509_v17, %v3383_v47  ;;  %v1669_v6 = vpack.c.bf16 %v1637_v5, %v1635_v4 }
 0x19b   : > { %v1670_v56 = vpack.c.bf16 %v1638_v19, %v1636_v38  ;;  %1701 = vst [vmem:[#allocation2 + $0xf0] sm:$0xff] %v1669_v6 }
 0x19d   : > { %1702 = vst [vmem:[#allocation2 + $0xf8] sm:$0xff] %v1670_v56 }
 0x19e PF: > { %v1752_v20 = vld [vmem:[#allocation2 + $0x8] sm:$0xff]  ;;  %v1751_v41 = vld [vmem:[#allocation2] sm:$0xff]  ;;  %v1754_v53 = vld [vmem:[#allocation2 + $0x18] sm:$0xff]  ;;  %s1957_s28 = sshll.u32 %s3002_s5, 4  ;;  %s3720_s23 = sld [smem:[#allocation33_spill]]  ;;  %s3559_s28 = int_to_ptr.vmem [resolvable:$true] %s1957_s28 }
 0x19f   : > { %1795 = vmatprep.subr.bf16.mxu0 %v1752_v20  ;;  %2159 = vmatprep.subr.bf16.mxu1 %v1752_v20  ;;  %v1753_v25 = vld [vmem:[#allocation2 + $0x10] sm:$0xff]  ;;  %v1756_v29 = vld [vmem:[#allocation2 + $0x28] sm:$0xff]  ;;  %v1755_v47 = vld [vmem:[#allocation2 + $0x20] sm:$0xff]  ;;  %s2471_s29 = scalar_lea.vmem %s3559_s28, 4096  ;;  %p3722_p11 = scmp.ne.s32.totalorder %s3700_s21, 0 }
 0x1a0   : > { %1796 = vmatpush1.bf16.msra.mxu0 %v1751_v41  ;;  %2175 = vmatpush1.bf16.msra.mxu1 %v1751_v41  ;;  %v1758_v31 = vld [vmem:[#allocation2 + $0x38] sm:$0xff]  ;;  %v1757_v13 = vld [vmem:[#allocation2 + $0x30] sm:$0xff]  ;;  %v1704_v33 = vld [vmem:[%s2970_s16 + $0x8] sm:$0xff]  ;;  %p2472_p9 = scmp.ne.s32.totalorder %s3559_s28, %s2471_s29  ;;  %s2635_s9 = smov [#allocation11]  }
 0x1a1   : > { %1797 = vmatprep.subr.bf16.mxu0 %v1754_v53  ;;  %2160 = vmatprep.subr.bf16.mxu1 %v1754_v53  ;;  %v1706_v34 = vld [vmem:[%s2970_s16 + $0x18] sm:$0xff]  ;;  %v1720_v7 = vld [vmem:[%s2970_s16 + $0x88] sm:$0xff]  ;;  %v1759_v43 = vld [vmem:[#allocation2 + $0x40] sm:$0xff]  ;;  %s2475_s8 = sshll.u32 %s2635_s9, 4  ;;  %s2476_s8 = int_to_ptr.vmem [resolvable:$false] %s2475_s8 }
 0x1a2   : > { %v1722_v36 = vld [vmem:[%s2970_s16 + $0x98] sm:$0xff]  ;;  %v1760_v12 = vld [vmem:[#allocation2 + $0x48] sm:$0xff]  ;;  %v1736_v27 = vpack.c.bf16 %v1706_v34, %v1704_v33  ;;  %v1761_v40 = vld [vmem:[#allocation2 + $0x50] sm:$0xff]  ;;  %p2473_p5 = pnand %p2472_p9, %p3722_p11  ;;  %s2477_s14 = scalar_lea.vmem %s2476_s8, 8192 }
 0x1a3   : > { %v1744_v9 = vpack.c.bf16 %v1722_v36, %v1720_v7  ;;  %v1762_v44 = vld [vmem:[#allocation2 + $0x58] sm:$0xff]  ;;  %v1764_v15 = vld [vmem:[#allocation2 + $0x68] sm:$0xff]  ;;  %v1763_v28 = vld [vmem:[#allocation2 + $0x60] sm:$0xff]  ;;  %p2478_p2 = scmp.lt.s32.totalorder %s3559_s28, %s2476_s8  ;;  %p2479_p12 = scmp.lt.s32.totalorder %s2477_s14, %s2471_s29 }
 0x1a4   : > { %1798 = vmatpush1.bf16.msra.mxu0 %v1753_v25  ;;  %2176 = vmatpush1.bf16.msra.mxu1 %v1753_v25  ;;  %v1766_v48 = vld [vmem:[#allocation2 + $0x78] sm:$0xff]  ;;  %v1765_v42 = vld [vmem:[#allocation2 + $0x70] sm:$0xff]  ;;  %v1768_v16 = vld [vmem:[#allocation2 + $0x88] sm:$0xff]  ;;  %s3721_s12 = smov %s3720_s23  ;;  %p2474_p3 = pneg %p2473_p5 }
 0x1a5   : > { %1799 = vmatprep.subr.bf16.mxu0 %v1756_v29  ;;  %2161 = vmatprep.subr.bf16.mxu1 %v1756_v29  ;;  %v1767_v45 = vld [vmem:[#allocation2 + $0x80] sm:$0xff]  ;;  %v1770_v37 = vld [vmem:[#allocation2 + $0x98] sm:$0xff]  ;;  %v1769_v46 = vld [vmem:[#allocation2 + $0x90] sm:$0xff]  ;;  %p2480_p1 = por %p2479_p12, %p2478_p2 }
 0x1a6   : > { %1827 = vmatprep.mubr.bf16.mxu0 %v1736_v27  ;;  %1867 = vmatprep.mubr.bf16.mxu1 %v1744_v9  ;;  %v1772_v49 = vld [vmem:[#allocation2 + $0xa8] sm:$0xff]  ;;  %v1771_v3 = vld [vmem:[#allocation2 + $0xa0] sm:$0xff]  ;;  %v1774_v50 = vld [vmem:[#allocation2 + $0xb8] sm:$0xff] }
 0x1a7   : > { %v1773_v51 = vld [vmem:[#allocation2 + $0xb0] sm:$0xff]  ;;  %v1776_v32 = vld [vmem:[#allocation2 + $0xc8] sm:$0xff]  ;;  %v1775_v35 = vld [vmem:[#allocation2 + $0xc0] sm:$0xff]  ;;  %p2481_p0 = pnand %p2480_p1, %p2474_p3 }
 0x1a8   : > { %1800 = vmatpush1.bf16.msra.mxu0 %v1755_v47  ;;  %2177 = vmatpush1.bf16.msra.mxu1 %v1755_v47  ;;  %v1778_v39 = vld [vmem:[#allocation2 + $0xd8] sm:$0xff]  ;;  %v1777_v14 = vld [vmem:[#allocation2 + $0xd0] sm:$0xff]  ;;  %v1780_v26 = vld [vmem:[#allocation2 + $0xe8] sm:$0xff] }
 0x1a9   : > { %1801 = vmatprep.subr.bf16.mxu0 %v1758_v31  ;;  %2162 = vmatprep.subr.bf16.mxu1 %v1758_v31  ;;  %v1779_v52 = vld [vmem:[#allocation2 + $0xe0] sm:$0xff]  ;;  %v1782_v61 = vld [vmem:[#allocation2 + $0xf8] sm:$0xff]  ;;  %v1781_v30 = vld [vmem:[#allocation2 + $0xf0] sm:$0xff] }
 0x1aa   : > { %v1703_v54 = vld [vmem:[%s2970_s16] sm:$0xff]  ;;  %v1705_v57 = vld [vmem:[%s2970_s16 + $0x10] sm:$0xff]  ;;  %v1708_v1 = vld [vmem:[%s2970_s16 + $0x28] sm:$0xff] }
 0x1ab   : > { %v1719_v60 = vld [vmem:[%s2970_s16 + $0x80] sm:$0xff]  ;;  %v1721_v63 = vld [vmem:[%s2970_s16 + $0x90] sm:$0xff]  ;;  %v1710_v55 = vld [vmem:[%s2970_s16 + $0x38] sm:$0xff]  ;;  %v1735_v59 = vpack.c.bf16 %v1705_v57, %v1703_v54 }
 0x1ac   : > { %1802 = vmatpush1.bf16.msra.mxu0 %v1757_v13  ;;  %2178 = vmatpush1.bf16.msra.mxu1 %v1757_v13  ;;  %v1724_v21 = vld [vmem:[%s2970_s16 + $0xa8] sm:$0xff]  ;;  %v1726_v58 = vld [vmem:[%s2970_s16 + $0xb8] sm:$0xff]  ;;  %v1743_v8 = vpack.c.bf16 %v1721_v63, %v1719_v60  ;;  %v1738_v10 = vpack.c.bf16 %v1710_v55, %v1708_v1  ;;  %v1707_v2 = vld [vmem:[%s2970_s16 + $0x20] sm:$0xff] }
 0x1ad   : > { %1803 = vmatprep.subr.bf16.mxu0 %v1760_v12  ;;  %2163 = vmatprep.subr.bf16.mxu1 %v1760_v12  ;;  %v1746_v11 = vpack.c.bf16 %v1726_v58, %v1724_v21  ;;  %v1709_v22 = vld [vmem:[%s2970_s16 + $0x30] sm:$0xff]  ;;  %v1723_v0 = vld [vmem:[%s2970_s16 + $0xa0] sm:$0xff]  ;;  %v1712_v23 = vld [vmem:[%s2970_s16 + $0x48] sm:$0xff] }
 0x1ae   : > { %v1725_v24 = vld [vmem:[%s2970_s16 + $0xb0] sm:$0xff]  ;;  %v1714_v18 = vld [vmem:[%s2970_s16 + $0x58] sm:$0xff]  ;;  %v1728_v62 = vld [vmem:[%s2970_s16 + $0xc8] sm:$0xff]  ;;  %v1737_v17 = vpack.c.bf16 %v1709_v22, %v1707_v2 }
 0x1af   : > { %v1730_v4 = vld [vmem:[%s2970_s16 + $0xd8] sm:$0xff]  ;;  %v1745_v5 = vpack.c.bf16 %v1725_v24, %v1723_v0  ;;  %v1740_v38 = vpack.c.bf16 %v1714_v18, %v1712_v23  ;;  %v1711_v6 = vld [vmem:[%s2970_s16 + $0x40] sm:$0xff]  ;;  %v1713_v56 = vld [vmem:[%s2970_s16 + $0x50] sm:$0xff] }
 0x1b0   : > { %1804 = vmatpush1.bf16.msra.mxu0 %v1759_v43  ;;  %2179 = vmatpush1.bf16.msra.mxu1 %v1759_v43  ;;  %v1748_v19 = vpack.c.bf16 %v1730_v4, %v1728_v62  ;;  %v1727_v20 = vld [vmem:[%s2970_s16 + $0xc0] sm:$0xff]  ;;  %v1729_v41 = vld [vmem:[%s2970_s16 + $0xd0] sm:$0xff]  ;;  %v1716_v53 = vld [vmem:[%s2970_s16 + $0x68] sm:$0xff]  ;;  %v1739_v31 = vpack.c.bf16 %v1713_v56, %v1711_v6 }
 0x1b1   : > { %1805 = vmatprep.subr.bf16.mxu0 %v1762_v44  ;;  %2164 = vmatprep.subr.bf16.mxu1 %v1762_v44  ;;  %v1718_v25 = vld [vmem:[%s2970_s16 + $0x78] sm:$0xff]  ;;  %v1732_v29 = vld [vmem:[%s2970_s16 + $0xe8] sm:$0xff]  ;;  %v1747_v13 = vpack.c.bf16 %v1729_v41, %v1727_v20  ;;  %v1715_v7 = vld [vmem:[%s2970_s16 + $0x60] sm:$0xff]  ;;  %v1785_v44 = vlaneseq }
 0x1b2   : > { %v1734_v47 = vld [vmem:[%s2970_s16 + $0xf8] sm:$0xff]  ;;  %v1742_v33 = vpack.c.bf16 %v1718_v25, %v1716_v53  ;;  %v1717_v36 = vld [vmem:[%s2970_s16 + $0x70] sm:$0xff]  ;;  %v1731_v12 = vld [vmem:[%s2970_s16 + $0xe0] sm:$0xff] }
 0x1b3   : > { %v1750_v34 = vpack.c.bf16 %v1734_v47, %v1732_v29  ;;  %v1733_v27 = vld [vmem:[%s2970_s16 + $0xf0] sm:$0xff]  ;;  %v1741_v9 = vpack.c.bf16 %v1717_v36, %v1715_v7  ;;  %s3719_s16 = sld [smem:[#allocation20_spill]] }
 0x1b4   : > { %1806 = vmatpush1.bf16.msra.mxu0 %v1761_v40  ;;  %2180 = vmatpush1.bf16.msra.mxu1 %v1761_v40  ;;  %v1749_v43 = vpack.c.bf16 %v1733_v27, %v1731_v12  ;;  %v1786_v40 = vshrl.u32 %v1785_v44, 7 }
 0x1b5   : > { %1807 = vmatprep.subr.bf16.mxu0 %v1764_v15  ;;  %2165 = vmatprep.subr.bf16.mxu1 %v1764_v15 }
 0x1b6   : > { %v1787_v15 = vsub.s32 0, %v1786_v40 }
 0x1b8   : > { %1808 = vmatpush1.bf16.msra.mxu0 %v1763_v28  ;;  %2181 = vmatpush1.bf16.msra.mxu1 %v1763_v28  ;;  %v1783_v28 = vld [vmem:[%s392_s20] sm:$0x3] }
 0x1b9   : > { %1809 = vmatprep.subr.bf16.mxu0 %v1766_v48  ;;  %2166 = vmatprep.subr.bf16.mxu1 %v1766_v48  ;;  %v1791_v48 = vsub.s32 1, %v1786_v40  ;;  %s2158_s4 = sshll.u32 %s3719_s16, 6 }
 0x1ba   : > { %s1954_s27 = sadd.s32 %s2158_s4, %s2990_s24  ;;  %s3571_s24 = scalar_lea.sflag [#allocation5], %s382_s13 }
 0x1bb   : > { %s2150_s26 = sshll.u32 %s1954_s27, 7 }
 0x1bc   : > { %1810 = vmatpush1.bf16.msra.mxu0 %v1765_v42  ;;  %2182 = vmatpush1.bf16.msra.mxu1 %v1765_v42  ;;  %v3491_v42 = vrot.slane %v1783_v28, %v1787_v15  ;;  %s3553_s10 = scalar_lea.hbm %s3720_s23, %s2150_s26 }
 0x1bd   : > { %1811 = vmatprep.subr.bf16.mxu0 %v1768_v16  ;;  %2167 = vmatprep.subr.bf16.mxu1 %v1768_v16  ;;  %v3493_v16 = vrot.slane %v1783_v28, %v1791_v48 }
 0x1c0   : > { %1812 = vmatpush1.bf16.msra.mxu0 %v1767_v45  ;;  %2183 = vmatpush1.bf16.msra.mxu1 %v1767_v45 }
 0x1c1   : > { %1813 = vmatprep.subr.bf16.mxu0 %v1770_v37  ;;  %2168 = vmatprep.subr.bf16.mxu1 %v1770_v37 }
 0x1c4   : > { %1814 = vmatpush1.bf16.msra.mxu0 %v1769_v46  ;;  %2184 = vmatpush1.bf16.msra.mxu1 %v1769_v46 }
 0x1c5   : > { %1815 = vmatprep.subr.bf16.mxu0 %v1772_v49  ;;  %2169 = vmatprep.subr.bf16.mxu1 %v1772_v49 }
 0x1c8   : > { %1816 = vmatpush1.bf16.msra.mxu0 %v1771_v3  ;;  %2185 = vmatpush1.bf16.msra.mxu1 %v1771_v3 }
 0x1c9   : > { %1817 = vmatprep.subr.bf16.mxu0 %v1774_v50  ;;  %2170 = vmatprep.subr.bf16.mxu1 %v1774_v50 }
 0x1cc   : > { %1818 = vmatpush1.bf16.msra.mxu0 %v1773_v51  ;;  %2186 = vmatpush1.bf16.msra.mxu1 %v1773_v51 }
 0x1cd   : > { %1819 = vmatprep.subr.bf16.mxu0 %v1776_v32  ;;  %2171 = vmatprep.subr.bf16.mxu1 %v1776_v32 }
 0x1d0   : > { %1820 = vmatpush1.bf16.msra.mxu0 %v1775_v35  ;;  %2187 = vmatpush1.bf16.msra.mxu1 %v1775_v35 }
 0x1d1   : > { %1821 = vmatprep.subr.bf16.mxu0 %v1778_v39  ;;  %2172 = vmatprep.subr.bf16.mxu1 %v1778_v39 }
 0x1d4   : > { %1822 = vmatpush1.bf16.msra.mxu0 %v1777_v14  ;;  %2188 = vmatpush1.bf16.msra.mxu1 %v1777_v14 }
 0x1d5   : > { %1823 = vmatprep.subr.bf16.mxu0 %v1780_v26  ;;  %2173 = vmatprep.subr.bf16.mxu1 %v1780_v26 }
 0x1d8   : > { %1824 = vmatpush1.bf16.msra.mxu0 %v1779_v52  ;;  %2189 = vmatpush1.bf16.msra.mxu1 %v1779_v52 }
 0x1d9   : > { %1825 = vmatprep.subr.bf16.mxu0 %v1782_v61  ;;  %2174 = vmatprep.subr.bf16.mxu1 %v1782_v61 }
 0x1dc   : > { %1826 = vmatpush1.bf16.msra.mxu0 %v1781_v30  ;;  %2190 = vmatpush1.bf16.msra.mxu1 %v1781_v30 }
 0x1df   : > { %1828 = vmatmul.mubr.bf16.vlgmr.msra.gmra.mrb[0].mxu0 %v1735_v59  ;;  %1868 = vmatmul.mubr.bf16.vlgmr.msra.gmra.mrb[0].mxu1 %v1743_v8 }
 0x1e0   : > { %1837 = vmatprep.mubr.bf16.mxu0 %v1738_v10  ;;  %1877 = vmatprep.mubr.bf16.mxu1 %v1746_v11 }
 0x1e7   : > { %1838 = vmatmul.mubr.bf16.gmra.mrb[4].mxu0 %v1737_v17  ;;  %1878 = vmatmul.mubr.bf16.gmra.mrb[4].mxu1 %v1745_v5 }
 0x1e8   : > { %1847 = vmatprep.mubr.bf16.mxu0 %v1740_v38  ;;  %1887 = vmatprep.mubr.bf16.mxu1 %v1748_v19 }
 0x1ef   : > { %1848 = vmatmul.mubr.bf16.gmra.mrb[8].mxu0 %v1739_v31  ;;  %1888 = vmatmul.mubr.bf16.gmra.mrb[8].mxu1 %v1747_v13 }
 0x1f0   : > { %1857 = vmatprep.mubr.bf16.mxu0 %v1742_v33  ;;  %1897 = vmatprep.mubr.bf16.mxu1 %v1750_v34 }
 0x1f7   : > { %1858 = vmatmul.mubr.bf16.gmra.mrb[12].mxu0 %v1741_v9  ;;  %1898 = vmatmul.mubr.bf16.gmra.mrb[12].mxu1 %v1749_v43 }
 0x2b2   : > { %v1829_v45 = vpop.f32.mrb[0].mxu0  ;;  %v1869_v37 = vpop.f32.mrb[0].mxu1 }
 0x2b3   : > { %v1830_v46 = vadd.f32 %v1829_v45, %v3491_v42  ;;  %v1870_v49 = vadd.f32 %v1869_v37, %v3491_v42  ;;  %v1831_v3 = vpop.f32.mrb[1].mxu0  ;;  %v1871_v50 = vpop.f32.mrb[1].mxu1 }
 0x2b4   : > { %v1832_v51 = vadd.f32 %v1831_v3, %v3493_v16  ;;  %v1872_v32 = vadd.f32 %v1871_v50, %v3493_v16  ;;  %v1833_v35 = vpop.f32.mrb[2].mxu0  ;;  %v1873_v39 = vpop.f32.mrb[2].mxu1 }
 0x2b5   : > { %1908 = vst [vmem:[%s3002_s5] sm:$0xff] %v1830_v46  ;;  %1924 = vst [vmem:[%s3002_s5 + $0x80] sm:$0xff] %v1870_v49  ;;  %v1834_v14 = vadd.f32 %v1833_v35, %v3491_v42  ;;  %v1874_v26 = vadd.f32 %v1873_v39, %v3491_v42  ;;  %v1835_v52 = vpop.f32.mrb[3].mxu0  ;;  %v1875_v61 = vpop.f32.mrb[3].mxu1 }
 0x2b6   : > { %1909 = vst [vmem:[%s3002_s5 + $0x8] sm:$0xff] %v1832_v51  ;;  %1925 = vst [vmem:[%s3002_s5 + $0x88] sm:$0xff] %v1872_v32  ;;  %v1836_v30 = vadd.f32 %v1835_v52, %v3493_v16  ;;  %v1876_v54 = vadd.f32 %v1875_v61, %v3493_v16 }
 0x2b7   : > { %1910 = vst [vmem:[%s3002_s5 + $0x10] sm:$0xff] %v1834_v14  ;;  %1926 = vst [vmem:[%s3002_s5 + $0x90] sm:$0xff] %v1874_v26 }
 0x2b8   : > { %1911 = vst [vmem:[%s3002_s5 + $0x18] sm:$0xff] %v1836_v30  ;;  %1927 = vst [vmem:[%s3002_s5 + $0x98] sm:$0xff] %v1876_v54 }
 0x2ba   : > { %v1839_v57 = vpop.f32.mrb[4].mxu0  ;;  %v1879_v60 = vpop.f32.mrb[4].mxu1 }
 0x2bb   : > { %v1840_v63 = vadd.f32 %v1839_v57, %v3491_v42  ;;  %v1880_v1 = vadd.f32 %v1879_v60, %v3491_v42  ;;  %v1841_v55 = vpop.f32.mrb[5].mxu0  ;;  %v1881_v21 = vpop.f32.mrb[5].mxu1 }
 0x2bc   : > { %v1842_v58 = vadd.f32 %v1841_v55, %v3493_v16  ;;  %v1882_v59 = vadd.f32 %v1881_v21, %v3493_v16  ;;  %v1843_v8 = vpop.f32.mrb[6].mxu0  ;;  %v1883_v10 = vpop.f32.mrb[6].mxu1 }
 0x2bd   : > { %1912 = vst [vmem:[%s3002_s5 + $0x20] sm:$0xff] %v1840_v63  ;;  %1928 = vst [vmem:[%s3002_s5 + $0xa0] sm:$0xff] %v1880_v1  ;;  %v1844_v11 = vadd.f32 %v1843_v8, %v3491_v42  ;;  %v1884_v2 = vadd.f32 %v1883_v10, %v3491_v42  ;;  %v1845_v22 = vpop.f32.mrb[7].mxu0  ;;  %v1885_v0 = vpop.f32.mrb[7].mxu1 }
 0x2be   : > { %1913 = vst [vmem:[%s3002_s5 + $0x28] sm:$0xff] %v1842_v58  ;;  %1929 = vst [vmem:[%s3002_s5 + $0xa8] sm:$0xff] %v1882_v59  ;;  %v1846_v24 = vadd.f32 %v1845_v22, %v3493_v16  ;;  %v1886_v23 = vadd.f32 %v1885_v0, %v3493_v16 }
 0x2bf   : > { %1914 = vst [vmem:[%s3002_s5 + $0x30] sm:$0xff] %v1844_v11  ;;  %1930 = vst [vmem:[%s3002_s5 + $0xb0] sm:$0xff] %v1884_v2 }
 0x2c0   : > { %1915 = vst [vmem:[%s3002_s5 + $0x38] sm:$0xff] %v1846_v24  ;;  %1931 = vst [vmem:[%s3002_s5 + $0xb8] sm:$0xff] %v1886_v23 }
 0x2c2   : > { %v1849_v18 = vpop.f32.mrb[8].mxu0  ;;  %v1889_v62 = vpop.f32.mrb[8].mxu1 }
 0x2c3   : > { %v1850_v4 = vadd.f32 %v1849_v18, %v3491_v42  ;;  %v1890_v17 = vadd.f32 %v1889_v62, %v3491_v42  ;;  %v1851_v5 = vpop.f32.mrb[9].mxu0  ;;  %v1891_v38 = vpop.f32.mrb[9].mxu1 }
 0x2c4   : > { %v1852_v19 = vadd.f32 %v1851_v5, %v3493_v16  ;;  %v1892_v6 = vadd.f32 %v1891_v38, %v3493_v16  ;;  %v1853_v56 = vpop.f32.mrb[10].mxu0  ;;  %v1893_v20 = vpop.f32.mrb[10].mxu1 }
 0x2c5   : > { %1916 = vst [vmem:[%s3002_s5 + $0x40] sm:$0xff] %v1850_v4  ;;  %1932 = vst [vmem:[%s3002_s5 + $0xc0] sm:$0xff] %v1890_v17  ;;  %v1854_v41 = vadd.f32 %v1853_v56, %v3491_v42  ;;  %v1894_v53 = vadd.f32 %v1893_v20, %v3491_v42  ;;  %v1855_v25 = vpop.f32.mrb[11].mxu0  ;;  %v1895_v29 = vpop.f32.mrb[11].mxu1 }
 0x2c6   : > { %1917 = vst [vmem:[%s3002_s5 + $0x48] sm:$0xff] %v1852_v19  ;;  %1933 = vst [vmem:[%s3002_s5 + $0xc8] sm:$0xff] %v1892_v6  ;;  %v1856_v47 = vadd.f32 %v1855_v25, %v3493_v16  ;;  %v1896_v31 = vadd.f32 %v1895_v29, %v3493_v16 }
 0x2c7   : > { %1918 = vst [vmem:[%s3002_s5 + $0x50] sm:$0xff] %v1854_v41  ;;  %1934 = vst [vmem:[%s3002_s5 + $0xd0] sm:$0xff] %v1894_v53 }
 0x2c8   : > { %1919 = vst [vmem:[%s3002_s5 + $0x58] sm:$0xff] %v1856_v47  ;;  %1935 = vst [vmem:[%s3002_s5 + $0xd8] sm:$0xff] %v1896_v31 }
 0x2ca   : > { %v1859_v13 = vpop.f32.mrb[12].mxu0  ;;  %v1899_v33 = vpop.f32.mrb[12].mxu1 }
 0x2cb   : > { %v1860_v34 = vadd.f32 %v1859_v13, %v3491_v42  ;;  %v1900_v7 = vadd.f32 %v1899_v33, %v3491_v42  ;;  %v1861_v36 = vpop.f32.mrb[13].mxu0  ;;  %v1901_v12 = vpop.f32.mrb[13].mxu1 }
 0x2cc   : > { %v1862_v27 = vadd.f32 %v1861_v36, %v3493_v16  ;;  %v1902_v9 = vadd.f32 %v1901_v12, %v3493_v16  ;;  %v1863_v43 = vpop.f32.mrb[14].mxu0  ;;  %v1903_v44 = vpop.f32.mrb[14].mxu1 }
 0x2cd   : > { %1920 = vst [vmem:[%s3002_s5 + $0x60] sm:$0xff] %v1860_v34  ;;  %1936 = vst [vmem:[%s3002_s5 + $0xe0] sm:$0xff] %v1900_v7  ;;  %v1864_v40 = vadd.f32 %v1863_v43, %v3491_v42  ;;  %v1904_v15 = vadd.f32 %v1903_v44, %v3491_v42  ;;  %v1865_v28 = vpop.f32.mrb[15].mxu0  ;;  %v1905_v48 = vpop.f32.mrb[15].mxu1 }
 0x2ce   : > { %1921 = vst [vmem:[%s3002_s5 + $0x68] sm:$0xff] %v1862_v27  ;;  %1937 = vst [vmem:[%s3002_s5 + $0xe8] sm:$0xff] %v1902_v9  ;;  %v1866_v45 = vadd.f32 %v1865_v28, %v3493_v16  ;;  %v1906_v37 = vadd.f32 %v1905_v48, %v3493_v16 }
 0x2cf   : > { %1922 = vst [vmem:[%s3002_s5 + $0x70] sm:$0xff] %v1864_v40  ;;  %1938 = vst [vmem:[%s3002_s5 + $0xf0] sm:$0xff] %v1904_v15 }
 0x2d0   : > { %1923 = vst [vmem:[%s3002_s5 + $0x78] sm:$0xff] %v1866_v45  ;;  %1939 = vst [vmem:[%s3002_s5 + $0xf8] sm:$0xff] %v1906_v37 }
 0x2d1   : > { %2484 = shalt.err (!%p2481_p0)
}
 0x2d2   : > { %s2485_s13 = scalar_lea.hbm %s3553_s10, 4096  ;;  %s2489_s5 = scalar_lea.hbm %s3721_s12, 16384 }
 0x2d3   : > { %p2486_p10 = scmp.ne.s32.totalorder %s3553_s10, %s2485_s13  ;;  %p2490_p6 = scmp.lt.u32.totalorder %s3553_s10, %s3721_s12 }
 0x2d4   : > { %p2491_p13 = scmp.lt.u32.totalorder %s2489_s5, %s2485_s13  ;;  %p2493_p9 = scmp.lt.u32.totalorder %s2485_s13, %s3553_s10 }
 0x2d5   : > { %p2487_p7 = pnand %p2486_p10, %p3722_p11 }
 0x2d6   : > { %p2492_p4 = por %p2491_p13, %p2490_p6 }
 0x2d7   : > { %p2488_p8 = pneg %p2487_p7 }
 0x2d8   : > { %p2494_p5 = por %p2493_p9, %p2492_p4 }
 0x2da   : > { %p2495_p3 = pnand %p2494_p5, %p2488_p8 }
 0x2dc   : > { %2498 = shalt.err (!%p2495_p3)
}
 0x2dd   : > { %s2636_s1 = smov 256   ;;  %s2637_s17 = smov 512  }
 0x2de   : > { %s2638_s16 = smov 16  }
 0x2df   : > { %2199 = dma.vmem_to_hbm [thread:$0]  (%p3722_p11), %s3559_s28, 4096, %s3553_s10, %s3571_s24, %s2636_s1, %s2637_s17, %s2638_s16  }
 0x2e0 PF: > { %s3723_s4 = sld [smem:[#allocation29_spill]]  ;;  %p2219_p2 = scmp.ge.s32.totalorder %s2625_s6, 2 }
 0x2e1   : > { %s1972_s27 = sand.u32 1, %s2573_s18  }
 0x2e2   : > { %s1973_s26 = scalar_lea.sflag [#allocation5], %s1972_s27 }
 0x2e6   : > { %p3724_p12 = scmp.ne.s32.totalorder %s3723_s4, 0 }
 0x2e8   : > { %p2215_p1 = pnand %p2219_p2, %p3724_p12 }
 0x2ea   : > { %2568 = dma.done.wait (!%p2215_p1), %s1973_s26, 4096  }
 0x2eb   : > { %2570 = vsyncadd (!%p2215_p1), %s1973_s26, 4294963200  ;;  %s27_s6 = sadd.s32 1, %s2625_s6   ;;  %s3726_s21 = sld [smem:[#allocation16_spill]] }
 0x2ec   : > { %p3600_p0 = scmp.ge.s32.totalorder %s27_s6, 6   ;;  %s3727_s20 = sld [smem:[#allocation28_spill]] }
 0x2ed   : > { %s3728_s28 = sld [smem:[#allocation17_spill]]  ;;  %s3729_s23 = sld [smem:[#allocation27_spill]] }
 0x2ee   : > { %s3730_s24 = sld [smem:[#allocation18_spill]]  ;;  %s3731_s25 = sld [smem:[#allocation19_spill]] }
 0x2ef   : > { %s3732_s26 = sld [smem:[#allocation26_spill]]  ;;  %s3733_s27 = sld [smem:[#allocation22_spill]] }
 0x2f0   : > { %s3734_s29 = sld [smem:[#allocation24_spill]]  ;;  %s3735_s15 = sld [smem:[#allocation25_spill]] }
 0x2f1   : > { %s3736_s18 = smov %s2577_s19  ;;  %s3737_s19 = smov %s3726_s21 }
 0x2f2   : > { %s3738_s21 = smov %s2589_s22  ;;  %26 = sbr.rel (!%p3600_p0) target bundleno = 19 (0x13), region = 129 }
 0x2f3   : > { %s3739_s22 = smov %s3728_s28  ;;  %s3740_s28 = smov %s2621_s30 }
 0x2f6   : > { %s3741_s30 = smov %s3735_s15 }
 0x2f9   :  { %1978 = vsyncpa [#allocation4], 1 }
 0x2fa   :  { %1980 = vsyncpa [#allocation4 + $0x1], 1 }
 0x2fb   :  { %1981 = vsyncpa [#allocation7], 1 }
 0x2fc   :  { %1983 = vsyncpa [#allocation7 + $0x1], 1 }
 0x2fd   :  { %1984 = vsyncpa [#allocation10], 1 }
 0x2fe   :  { %1986 = vsyncpa [#allocation10 + $0x1], 1 }
 0x2ff   :  { %1987 = vsyncpa [#allocation5], 1 }
 0x300   :  { %1989 = vsyncpa [#allocation5 + $0x1], 1 }

</bundles_post_ra>
